<compile_context>
chip_gen: v7x
topology: tpu7x:2x2x1
jax: 0.10.0
libtpu: 0.0.40
codegen_flags: <defaults>
</compile_context>

<pallas_src>
import jax
import jax.numpy as jnp
from jax.experimental import pallas as pl
from jax.experimental.pallas import tpu as pltpu


# ----------------------------------------------------------------------------
# helpers
# ----------------------------------------------------------------------------
def _round_up(x, m):
    return ((x + m - 1) // m) * m


def _pad_axis(x, size, axis):
    if x.shape[axis] == size:
        return x
    pad = [(0, 0)] * x.ndim
    pad[axis] = (0, size - x.shape[axis])
    return jnp.pad(x, pad)


# ----------------------------------------------------------------------------
# fused decoder-step kernel: attention + context + GRU cell + tiled fc_out
#   grid = (batch_tiles [parallel], vocab_tiles [arbitrary])
# ----------------------------------------------------------------------------
def _decoder_step_kernel(enc_ref, hid_ref, mask_ref, emb_ref, ph_ref,
                         weT_ref, v_ref, wihT_ref, whhT_ref, bih_ref, bhh_ref,
                         fcT_ref, fcb_ref,
                         pred_ref, hnew_ref, attn_ref,
                         xfc_ref):
    f32 = jnp.float32
    mxu = fcT_ref.dtype                       # bf16 (or f32) MXU operand dtype
    j = pl.program_id(1)                      # vocab-tile index

    # ---- attention + context + GRU: only on the first vocab tile -----------
    @pl.when(j == 0)
    def _():
        enc = enc_ref[...]                    # [BT, S, 2H]   (mxu dtype)
        h_prev = hid_ref[...]                 # [BT, H]       f32
        emb = emb_ref[...]                    # [BT, E]       (mxu dtype)
        bt, s_len, e2 = enc.shape
        hd = h_prev.shape[-1]

        # energy = tanh(enc @ We^T + proj_h); batch tile folded into GEMM M dim
        eproj = jnp.dot(enc.reshape(bt * s_len, e2), weT_ref[...],
                        preferred_element_type=f32)              # [BT*S, H]
        energy = jnp.tanh(eproj.reshape(bt, s_len, hd) + ph_ref[...])  # f32

        # scores = <energy, v>: VPU broadcast-multiply + lane reduce
        scores = jnp.sum(energy * v_ref[...], axis=-1, keepdims=True)  # [BT,S,1]
        scores = jnp.where(mask_ref[...] == 0, jnp.float32(-1e10), scores)

        # numerically-stable softmax over src_len (sublane axis), f32
        m = jnp.max(scores, axis=1, keepdims=True)
        ex = jnp.exp(scores - m)
        attn = ex / jnp.sum(ex, axis=1, keepdims=True)                 # [BT,S,1]
        attn_ref[...] = attn.astype(attn_ref.dtype)

        # weighted context (torch.bmm fused; enc tile reused in VMEM)
        wctx = jnp.sum(attn * enc.astype(f32), axis=1)                 # [BT,2H] f32
        wctx_mx = wctx.astype(mxu)

        # single-layer GRU cell (gate order r|z|n), collapsed into 2 matmuls
        x_in = jnp.concatenate([emb, wctx_mx], axis=-1)                # [BT, E+2H]
        gi = (jnp.dot(x_in, wihT_ref[...], preferred_element_type=f32)
              + bih_ref[...])                                          # [BT, 3H]
        gh = (jnp.dot(h_prev.astype(mxu), whhT_ref[...],
                      preferred_element_type=f32) + bhh_ref[...])      # [BT, 3H]
        r = jax.nn.sigmoid(gi[:, :hd] + gh[:, :hd])
        z = jax.nn.sigmoid(gi[:, hd:2 * hd] + gh[:, hd:2 * hd])
        n = jnp.tanh(gi[:, 2 * hd:] + r * gh[:, 2 * hd:])
        h_new = (1.0 - z) * n + z * h_prev                             # [BT, H] f32
        hnew_ref[...] = h_new.astype(hnew_ref.dtype)                   # GRU output

        # carry cat([output, weighted, embedded]) across the vocab axis
        xfc_ref[...] = jnp.concatenate([h_new.astype(mxu), wctx_mx, emb],
                                       axis=-1)                        # [BT, fc_in]

    # ---- prediction tile: one fused [BT, fc_in] @ [fc_in, V_TILE] GEMM ------
    pred = (jnp.dot(xfc_ref[...], fcT_ref[...],
                    preferred_element_type=jnp.float32) + fcb_ref[...])
    pred_ref[...] = pred.astype(pred_ref.dtype)


# ----------------------------------------------------------------------------
# wrapper
# ----------------------------------------------------------------------------
def decoder_forward_pallas(tokens, hidden, encoder_outputs, mask, params,
                           b_tile=None, v_tile=None, mxu_dtype=jnp.bfloat16):
    """tokens [B] int, hidden [B,H], encoder_outputs [B,S,2H], mask [B,S].

    Returns (prediction [B, output_dim], new_hidden [B, H], attention [B, S]).
    (torch's .unsqueeze/.squeeze(0) bookkeeping on `a`/`hidden` is omitted.)
    """
    B, S, E2 = encoder_outputs.shape
    H = hidden.shape[-1]
    emb_table = params["embedding"]
    E = emb_table.shape[-1]
    Vout = params["fc_w"].shape[0]
    fc_in = H + E2 + E
    mxu_bytes = jnp.dtype(mxu_dtype).itemsize
    S_pad = _round_up(S, 8)                       # sublane-aligned src_len

    # ---- vocab tiling (fc_out streams in lane-dense V_TILE chunks) ---------
    v_round = _round_up(Vout, 128)
    vt = _round_up(v_tile, 128) if v_tile else min(v_round, 2048)
    v_pad = _round_up(Vout, vt)

    # ---- VMEM budget + batch-tile selection ---------------------------------
    try:
        vmem_cap = pltpu.get_tpu_info().vmem_capacity_bytes
    except Exception:
        vmem_cap = 64 * 1024 * 1024               # conservative (v7x per-TC)
    vmem_limit = int(min(0.8 * vmem_cap, 100 * 1024 * 1024))

    def _vmem_estimate(bt):
        f32b = 4
        b = 2 * bt * S_pad * E2 * mxu_bytes                  # enc tile (dbl-buffered)
        b += 2 * bt * S_pad * 128 * f32b                     # int mask (lane-padded)
        b += 2 * bt * (E * mxu_bytes + 2 * H * f32b)         # emb + hidden + hoisted proj
        b += 2 * bt * vt * f32b                              # prediction tile
        b += 2 * bt * (H + S_pad * 128) * f32b               # hnew + attention outputs
        b += bt * fc_in * mxu_bytes                          # x_fc scratch
        b += 3 * bt * S_pad * H * f32b                       # energy/eproj intermediates
        b += (E2 * H + (E + E2) * 3 * H + 3 * H * H) * mxu_bytes   # Buffered(1) weights
        b += 2 * (fc_in * vt * mxu_bytes + vt * f32b)        # fc_out tile (dbl-buffered)
        b += 8 * H * f32b                                    # biases + v
        return b

    if b_tile is None:
        # keep >= 2 grid steps when B > 8 so both v7x TensorCores get work
        bt_cap = max(8, _round_up(-(-B // 2), 8))
        bt = 8
        for cand in (256, 128, 64, 32, 16, 8):
            if cand <= bt_cap and _vmem_estimate(cand) <= 0.7 * vmem_limit:
                bt = cand
                break
    else:
        bt = _round_up(max(b_tile, 8), 8)
    b_pad = _round_up(B, bt)

    # ---- pad + cast inputs (padded rows / source positions are inert) ------
    tokens_p = _pad_axis(tokens.astype(jnp.int32), b_pad, 0)
    hidden_p = _pad_axis(hidden.astype(jnp.float32), b_pad, 0)
    enc_p = _pad_axis(_pad_axis(encoder_outputs.astype(jnp.float32), b_pad, 0),
                      S_pad, 1).astype(mxu_dtype)
    mask3_p = _pad_axis(_pad_axis(mask.astype(jnp.int32), b_pad, 0),
                        S_pad, 1)[:, :, None]                       # [Bp,S,1] int32

    # ---- embedding gather in the wrapper (XLA fuses it) --------------------
    embedded = jnp.take(emb_table.astype(mxu_dtype), tokens_p, axis=0)  # [Bp, E]
    # TODO(synk): nn.Dropout is implemented as eval-mode identity (no RNG dropout).

    # ---- attention params: hoist the hidden projection to one dense GEMM ---
    w_attn = params["w_attn"]                     # [H, H + 2H]
    wh, we = w_attn[:, :H], w_attn[:, H:]
    ph3 = ((hidden_p @ wh.T + params["b_attn"])[:, None, :]).astype(jnp.float32)
    weT = we.T.astype(mxu_dtype)                  # [2H, H]
    v3 = params["v_w"].reshape(1, 1, H).astype(jnp.float32)

    # ---- GRU params (gate order r|z|n stacked in rows), fused transposes ---
    wihT = params["w_ih"].T.astype(mxu_dtype)     # [E+2H, 3H]
    whhT = params["w_hh"].T.astype(mxu_dtype)     # [H, 3H]
    bih = params["b_ih"].reshape(1, 3 * H).astype(jnp.float32)
    bhh = params["b_hh"].reshape(1, 3 * H).astype(jnp.float32)

    # ---- fc_out params in cat([output, weighted, embedded]) order ----------
    fcT = _pad_axis(params["fc_w"].T.astype(mxu_dtype), v_pad, 1)   # [fc_in, Vp]
    fcb = _pad_axis(params["fc_b"].reshape(1, Vout).astype(jnp.float32), v_pad, 1)

    grid = (b_pad // bt, v_pad // vt)
    once = dict(pipeline_mode=pl.Buffered(1))     # grid-invariant weights: 1 buffer

    pred, h_new, attn3 = pl.pallas_call(
        _decoder_step_kernel,
        out_shape=(
            jax.ShapeDtypeStruct((b_pad, v_pad), jnp.float32),
            jax.ShapeDtypeStruct((b_pad, H), jnp.float32),
            jax.ShapeDtypeStruct((b_pad, S_pad, 1), jnp.float32),
        ),
        grid=grid,
        in_specs=[
            pl.BlockSpec((bt, S_pad, E2), lambda i, j: (i, 0, 0)),      # encoder outs
            pl.BlockSpec((bt, H), lambda i, j: (i, 0)),                 # prev hidden
            pl.BlockSpec((bt, S_pad, 1), lambda i, j: (i, 0, 0)),       # int mask
            pl.BlockSpec((bt, E), lambda i, j: (i, 0)),                 # embedded
            pl.BlockSpec((bt, 1, H), lambda i, j: (i, 0, 0)),           # hidden proj
            pl.BlockSpec((E2, H), lambda i, j: (0, 0), **once),         # We^T
            pl.BlockSpec((1, 1, H), lambda i, j: (0, 0, 0), **once),    # v
            pl.BlockSpec((E + E2, 3 * H), lambda i, j: (0, 0), **once), # W_ih^T
            pl.BlockSpec((H, 3 * H), lambda i, j: (0, 0), **once),      # W_hh^T
            pl.BlockSpec((1, 3 * H), lambda i, j: (0, 0), **once),      # b_ih
            pl.BlockSpec((1, 3 * H), lambda i, j: (0, 0), **once),      # b_hh
            pl.BlockSpec((fc_in, vt), lambda i, j: (0, j)),             # fc_out^T tile
            pl.BlockSpec((1, vt), lambda i, j: (0, j)),                 # fc bias tile
        ],
        out_specs=[
            pl.BlockSpec((bt, vt), lambda i, j: (i, j)),                # prediction
            pl.BlockSpec((bt, H), lambda i, j: (i, 0)),                 # new hidden
            pl.BlockSpec((bt, S_pad, 1), lambda i, j: (i, 0, 0)),       # attention
        ],
        scratch_shapes=[pltpu.VMEM((bt, fc_in), mxu_dtype)],            # cat carry
        compiler_params=pltpu.CompilerParams(
            dimension_semantics=("parallel", "arbitrary"),
            vmem_limit_bytes=vmem_limit),
    )(enc_p, hidden_p, mask3_p, embedded, ph3, weT, v3,
      wihT, whhT, bih, bhh, fcT, fcb)

    return pred[:B, :Vout], h_new[:B], attn3[:B, :S, 0]


# ----------------------------------------------------------------------------
# pure-JAX reference mirroring the PyTorch forward (eval mode, n_layers=1)
# ----------------------------------------------------------------------------
def decoder_ref(tokens, hidden, encoder_outputs, mask, params):
    emb = params["embedding"][tokens]                                # [B, E]
    B, S, _ = encoder_outputs.shape
    H = hidden.shape[-1]
    h_rep = jnp.repeat(hidden[:, None, :], S, axis=1)
    x = jnp.concatenate([h_rep, encoder_outputs], axis=-1)
    energy = jnp.tanh(x @ params["w_attn"].T + params["b_attn"])
    scores = (energy @ params["v_w"].T)[..., 0]
    scores = jnp.where(mask == 0, -1e10, scores)
    a = jax.nn.softmax(scores, axis=1)                               # [B, S]
    weighted = jnp.einsum("bs,bse->be", a, encoder_outputs)          # [B, 2H]
    x_rnn = jnp.concatenate([emb, weighted], axis=-1)
    gi = x_rnn @ params["w_ih"].T + params["b_ih"]
    gh = hidden @ params["w_hh"].T + params["b_hh"]
    r = jax.nn.sigmoid(gi[:, :H] + gh[:, :H])
    z = jax.nn.sigmoid(gi[:, H:2 * H] + gh[:, H:2 * H])
    n = jnp.tanh(gi[:, 2 * H:] + r * gh[:, 2 * H:])
    h_new = (1.0 - z) * n + z * hidden
    pred = (jnp.concatenate([h_new, weighted, emb], axis=-1) @ params["fc_w"].T
            + params["fc_b"])
    return pred, h_new, a


# ----------------------------------------------------------------------------
# demo / self-check
# ----------------------------------------------------------------------------
if __name__ == "__main__":
    S = 8
    hid_dim = 32            # H (encoder outputs carry 2*H features)
    emb_dim = 16
    output_dim = 256        # vocab; with v_tile=128 the vocab grid axis has 2 steps

    H, E, V = hid_dim, emb_dim, output_dim
    E2 = 2 * H
    attn_in = 3 * H         # cat([hidden (H), enc_out (2H)])
    fc_in = H + E2 + E

    key = jax.random.PRNGKey(0)
    keys = jax.random.split(key, 16)

    def lin_init(k, shape, fan_in):
        lim = 1.0 / jnp.sqrt(fan_in)
        return jax.random.uniform(k, shape, jnp.float32, -lim, lim)

    params = {
        "embedding": jax.random.normal(keys[0], (V, E), jnp.float32),
        "w_attn": lin_init(keys[1], (H, attn_in), attn_in),
        "b_attn": lin_init(keys[2], (H,), attn_in),
        "v_w": lin_init(keys[3], (1, H), H),
        "w_ih": lin_init(keys[4], (3 * H, E + E2), H),     # GRU gates stacked r|z|n
        "b_ih": lin_init(keys[5], (3 * H,), H),
        "w_hh": lin_init(keys[6], (3 * H, H), H),
        "b_hh": lin_init(keys[7], (3 * H,), H),
        "fc_w": lin_init(keys[8], (V, fc_in), fc_in),
        "fc_b": lin_init(keys[9], (V,), fc_in),
    }

    def make_inputs(batch, seed_off):
        ks = jax.random.split(jax.random.PRNGKey(seed_off), 4)
        toks = jax.random.randint(ks[0], (batch,), 0, V)
        hid = jax.random.normal(ks[1], (batch, H), jnp.float32)
        enc = jax.random.normal(ks[2], (batch, S, E2), jnp.float32)
        msk = (jax.random.uniform(ks[3], (batch, S)) > 0.25).astype(jnp.int32)
        return toks, hid, enc, msk.at[:, 0].set(1)

    # --- check 1: B=2, exact f32 MXU path, tight tolerance ------------------
    tokens, hidden, enc, mask = make_inputs(2, 1)
    got = decoder_forward_pallas(tokens, hidden, enc, mask, params,
                                 v_tile=128, mxu_dtype=jnp.float32)
    got = jax.block_until_ready(got)
    want = decoder_ref(tokens, hidden, enc, mask, params)
    assert got[0].shape == (2, V) and got[1].shape == (2, H) and got[2].shape == (2, S)
    for g, w, name in zip(got, want, ("prediction", "hidden", "attention")):
        assert jnp.allclose(g, w, atol=1e-4, rtol=1e-4), f"f32 mismatch: {name}"

    # --- check 2: B=10 (pads to 2 batch tiles), bf16 MXU path ---------------
    tokens, hidden, enc, mask = make_inputs(10, 2)
    got = decoder_forward_pallas(tokens, hidden, enc, mask, params,
                                 v_tile=128, mxu_dtype=jnp.bfloat16)
    got = jax.block_until_ready(got)
    want = decoder_ref(tokens, hidden, enc, mask, params)
    assert got[0].shape == (10, V) and got[1].shape == (10, H) and got[2].shape == (10, S)
    for g, w, name in zip(got, want, ("prediction", "hidden", "attention")):
        assert jnp.allclose(g, w, atol=3e-2, rtol=3e-2), f"bf16 mismatch: {name}"

    print("KERNEL_OK")
</pallas_src>

<mosaic_0001>
module attributes {stable_mosaic.version = 11 : i64} {
  func.func @_decoder_step_kernel(%arg0: i32, %arg1: i32, %arg2: memref<8x8x64xf32, #tpu.memory_space<vmem>>, %arg3: memref<8x32xf32, #tpu.memory_space<vmem>>, %arg4: memref<8x8x1xi32, #tpu.memory_space<vmem>>, %arg5: memref<8x16xf32, #tpu.memory_space<vmem>>, %arg6: memref<8x1x32xf32, #tpu.memory_space<vmem>>, %arg7: memref<64x32xf32, #tpu.memory_space<vmem>>, %arg8: memref<1x1x32xf32, #tpu.memory_space<vmem>>, %arg9: memref<80x96xf32, #tpu.memory_space<vmem>>, %arg10: memref<32x96xf32, #tpu.memory_space<vmem>>, %arg11: memref<1x96xf32, #tpu.memory_space<vmem>>, %arg12: memref<1x96xf32, #tpu.memory_space<vmem>>, %arg13: memref<112x128xf32, #tpu.memory_space<vmem>>, %arg14: memref<1x128xf32, #tpu.memory_space<vmem>>, %arg15: memref<8x128xf32, #tpu.memory_space<vmem>>, %arg16: memref<8x32xf32, #tpu.memory_space<vmem>>, %arg17: memref<8x8x1xf32, #tpu.memory_space<vmem>>, %arg18: memref<8x112xf32, #tpu.memory_space<vmem>>) attributes {dimension_semantics = [#tpu.dimension_semantics<parallel>, #tpu.dimension_semantics<arbitrary>], iteration_bounds = array<i64: 1, 2>, scalar_prefetch = 0 : i64, scratch_operands = 1 : i64, tpu.core_type = #tpu.core_type<tc>, window_params = [{transform_indices = @transform_0, window_bounds = array<i64: 8, 8, 64>}, {transform_indices = @transform_1, window_bounds = array<i64: 8, 32>}, {transform_indices = @transform_2, window_bounds = array<i64: 8, 8, 1>}, {transform_indices = @transform_3, window_bounds = array<i64: 8, 16>}, {transform_indices = @transform_4, window_bounds = array<i64: 8, 1, 32>}, {pipeline_mode = #tpu.pipeline_mode<synchronous>, transform_indices = @transform_5, window_bounds = array<i64: 64, 32>}, {pipeline_mode = #tpu.pipeline_mode<synchronous>, transform_indices = @transform_6, window_bounds = array<i64: 1, 1, 32>}, {pipeline_mode = #tpu.pipeline_mode<synchronous>, transform_indices = @transform_7, window_bounds = array<i64: 80, 96>}, {pipeline_mode = #tpu.pipeline_mode<synchronous>, transform_indices = @transform_8, window_bounds = array<i64: 32, 96>}, {pipeline_mode = #tpu.pipeline_mode<synchronous>, transform_indices = @transform_9, window_bounds = array<i64: 1, 96>}, {pipeline_mode = #tpu.pipeline_mode<synchronous>, transform_indices = @transform_10, window_bounds = array<i64: 1, 96>}, {transform_indices = @transform_11, window_bounds = array<i64: 112, 128>}, {transform_indices = @transform_12, window_bounds = array<i64: 1, 128>}, {transform_indices = @transform_13, window_bounds = array<i64: 8, 128>}, {transform_indices = @transform_14, window_bounds = array<i64: 8, 32>}, {transform_indices = @transform_15, window_bounds = array<i64: 8, 8, 1>}]} {
    %c0_i32 = arith.constant 0 : i32
    %0 = arith.cmpi eq, %arg1, %c0_i32 : i32
    %1 = arith.extui %0 : i1 to i32
    %c0_i32_0 = arith.constant 0 : i32
    %2 = arith.cmpi ne, %1, %c0_i32_0 : i32
    scf.if %2 {
      %c0_8 = arith.constant 0 : index
      %c0_9 = arith.constant 0 : index
      %c0_10 = arith.constant 0 : index
      %10 = vector.load %arg2[%c0_8, %c0_9, %c0_10] : memref<8x8x64xf32, #tpu.memory_space<vmem>>, vector<8x8x64xf32>
      %c0_11 = arith.constant 0 : index
      %c0_12 = arith.constant 0 : index
      %11 = vector.load %arg3[%c0_11, %c0_12] : memref<8x32xf32, #tpu.memory_space<vmem>>, vector<8x32xf32>
      %c0_13 = arith.constant 0 : index
      %c0_14 = arith.constant 0 : index
      %12 = vector.load %arg5[%c0_13, %c0_14] : memref<8x16xf32, #tpu.memory_space<vmem>>, vector<8x16xf32>
      %13 = vector.shape_cast %10 : vector<8x8x64xf32> to vector<64x64xf32>
      %c0_15 = arith.constant 0 : index
      %c0_16 = arith.constant 0 : index
      %14 = vector.load %arg7[%c0_15, %c0_16] : memref<64x32xf32, #tpu.memory_space<vmem>>, vector<64x32xf32>
      %cst_17 = arith.constant dense<0.000000e+00> : vector<64x32xf32>
      %15 = tpu.matmul %13, %14, %cst_17 {dimension_numbers = #tpu.dot_dimension_numbers<[1], [0], [0], [1], [0, 0, 1, 1], [], []>} : vector<64x64xf32>, vector<64x32xf32>, vector<64x32xf32> -> vector<64x32xf32>
      %16 = vector.shape_cast %15 : vector<64x32xf32> to vector<8x8x32xf32>
      %c0_18 = arith.constant 0 : index
      %c0_19 = arith.constant 0 : index
      %c0_20 = arith.constant 0 : index
      %17 = vector.load %arg6[%c0_18, %c0_19, %c0_20] : memref<8x1x32xf32, #tpu.memory_space<vmem>>, vector<8x1x32xf32>
      %18 = vector.broadcast %17 : vector<8x1x32xf32> to vector<8x8x32xf32>
      %19 = arith.addf %16, %18 : vector<8x8x32xf32>
      %20 = math.tanh %19 : vector<8x8x32xf32>
      %c0_21 = arith.constant 0 : index
      %c0_22 = arith.constant 0 : index
      %c0_23 = arith.constant 0 : index
      %21 = vector.load %arg8[%c0_21, %c0_22, %c0_23] : memref<1x1x32xf32, #tpu.memory_space<vmem>>, vector<1x1x32xf32>
      %22 = vector.broadcast %21 : vector<1x1x32xf32> to vector<8x8x32xf32>
      %23 = arith.mulf %20, %22 : vector<8x8x32xf32>
      %cst_24 = arith.constant dense<0.000000e+00> : vector<8x8xf32>
      %24 = vector.multi_reduction <add>, %23, %cst_24 [2] : vector<8x8x32xf32> to vector<8x8xf32>
      %25 = vector.shape_cast %24 : vector<8x8xf32> to vector<8x8x1xf32>
      %c0_25 = arith.constant 0 : index
      %c0_26 = arith.constant 0 : index
      %c0_27 = arith.constant 0 : index
      %26 = vector.load %arg4[%c0_25, %c0_26, %c0_27] : memref<8x8x1xi32, #tpu.memory_space<vmem>>, vector<8x8x1xi32>
      %c0_i32_28 = arith.constant 0 : i32
      %27 = vector.broadcast %c0_i32_28 : i32 to vector<8x8x1xi32>
      %28 = arith.cmpi eq, %26, %27 : vector<8x8x1xi32>
      %cst_29 = arith.constant -1.000000e+10 : f32
      %29 = vector.broadcast %cst_29 : f32 to vector<8x8x1xf32>
      %30 = arith.select %28, %29, %25 : vector<8x8x1xi1>, vector<8x8x1xf32>
      %cst_30 = arith.constant dense<0xFF800000> : vector<8x1xf32>
      %31 = vector.multi_reduction <maximumf>, %30, %cst_30 [1] : vector<8x8x1xf32> to vector<8x1xf32>
      %32 = vector.shape_cast %31 : vector<8x1xf32> to vector<8x1x1xf32>
      %33 = vector.broadcast %32 : vector<8x1x1xf32> to vector<8x8x1xf32>
      %34 = arith.subf %30, %33 : vector<8x8x1xf32>
      %35 = math.exp %34 : vector<8x8x1xf32>
      %cst_31 = arith.constant dense<0.000000e+00> : vector<8x1xf32>
      %36 = vector.multi_reduction <add>, %35, %cst_31 [1] : vector<8x8x1xf32> to vector<8x1xf32>
      %37 = vector.shape_cast %36 : vector<8x1xf32> to vector<8x1x1xf32>
      %38 = vector.broadcast %37 : vector<8x1x1xf32> to vector<8x8x1xf32>
      %39 = arith.divf %35, %38 : vector<8x8x1xf32>
      %c0_32 = arith.constant 0 : index
      %c0_33 = arith.constant 0 : index
      %c0_34 = arith.constant 0 : index
      %40 = vector.load %arg17[%c0_32, %c0_33, %c0_34] : memref<8x8x1xf32, #tpu.memory_space<vmem>>, vector<8x8x1xf32>
      tpu.vector_store %arg17[%c0_32, %c0_33, %c0_34], %39 {strides = array<i32>} : memref<8x8x1xf32, #tpu.memory_space<vmem>>, vector<8x8x1xf32>,
      %41 = vector.broadcast %39 : vector<8x8x1xf32> to vector<8x8x64xf32>
      %42 = arith.mulf %41, %10 : vector<8x8x64xf32>
      %cst_35 = arith.constant dense<0.000000e+00> : vector<8x64xf32>
      %43 = vector.multi_reduction <add>, %42, %cst_35 [1] : vector<8x8x64xf32> to vector<8x64xf32>
      %44 = tpu.concatenate %12, %43 in 1 : vector<8x16xf32>, vector<8x64xf32> -> vector<8x80xf32>
      %c0_36 = arith.constant 0 : index
      %c0_37 = arith.constant 0 : index
      %45 = vector.load %arg9[%c0_36, %c0_37] : memref<80x96xf32, #tpu.memory_space<vmem>>, vector<80x96xf32>
      %cst_38 = arith.constant dense<0.000000e+00> : vector<8x96xf32>
      %46 = tpu.matmul %44, %45, %cst_38 {dimension_numbers = #tpu.dot_dimension_numbers<[1], [0], [0], [1], [0, 0, 1, 1], [], []>} : vector<8x80xf32>, vector<80x96xf32>, vector<8x96xf32> -> vector<8x96xf32>
      %c0_39 = arith.constant 0 : index
      %c0_40 = arith.constant 0 : index
      %47 = vector.load %arg11[%c0_39, %c0_40] : memref<1x96xf32, #tpu.memory_space<vmem>>, vector<1x96xf32>
      %48 = vector.broadcast %47 : vector<1x96xf32> to vector<8x96xf32>
      %49 = arith.addf %46, %48 : vector<8x96xf32>
      %c0_41 = arith.constant 0 : index
      %c0_42 = arith.constant 0 : index
      %50 = vector.load %arg10[%c0_41, %c0_42] : memref<32x96xf32, #tpu.memory_space<vmem>>, vector<32x96xf32>
      %cst_43 = arith.constant dense<0.000000e+00> : vector<8x96xf32>
      %51 = tpu.matmul %11, %50, %cst_43 {dimension_numbers = #tpu.dot_dimension_numbers<[1], [0], [0], [1], [0, 0, 1, 1], [], []>} : vector<8x32xf32>, vector<32x96xf32>, vector<8x96xf32> -> vector<8x96xf32>
      %c0_44 = arith.constant 0 : index
      %c0_45 = arith.constant 0 : index
      %52 = vector.load %arg12[%c0_44, %c0_45] : memref<1x96xf32, #tpu.memory_space<vmem>>, vector<1x96xf32>
      %53 = vector.broadcast %52 : vector<1x96xf32> to vector<8x96xf32>
      %54 = arith.addf %51, %53 : vector<8x96xf32>
      %55 = vector.extract_strided_slice %49 {offsets = [0, 0], sizes = [8, 32], strides = [1, 1]} : vector<8x96xf32> to vector<8x32xf32>
      %56 = vector.extract_strided_slice %54 {offsets = [0, 0], sizes = [8, 32], strides = [1, 1]} : vector<8x96xf32> to vector<8x32xf32>
      %57 = arith.addf %55, %56 : vector<8x32xf32>
      %58 = arith.negf %57 : vector<8x32xf32>
      %59 = math.exp %58 : vector<8x32xf32>
      %cst_46 = arith.constant 1.000000e+00 : f32
      %60 = vector.broadcast %cst_46 : f32 to vector<8x32xf32>
      %61 = arith.addf %60, %59 : vector<8x32xf32>
      %62 = arith.divf %60, %61 : vector<8x32xf32>
      %63 = vector.extract_strided_slice %49 {offsets = [0, 32], sizes = [8, 32], strides = [1, 1]} : vector<8x96xf32> to vector<8x32xf32>
      %64 = vector.extract_strided_slice %54 {offsets = [0, 32], sizes = [8, 32], strides = [1, 1]} : vector<8x96xf32> to vector<8x32xf32>
      %65 = arith.addf %63, %64 : vector<8x32xf32>
      %66 = arith.negf %65 : vector<8x32xf32>
      %67 = math.exp %66 : vector<8x32xf32>
      %cst_47 = arith.constant 1.000000e+00 : f32
      %68 = vector.broadcast %cst_47 : f32 to vector<8x32xf32>
      %69 = arith.addf %68, %67 : vector<8x32xf32>
      %70 = arith.divf %68, %69 : vector<8x32xf32>
      %71 = vector.extract_strided_slice %49 {offsets = [0, 64], sizes = [8, 32], strides = [1, 1]} : vector<8x96xf32> to vector<8x32xf32>
      %72 = vector.extract_strided_slice %54 {offsets = [0, 64], sizes = [8, 32], strides = [1, 1]} : vector<8x96xf32> to vector<8x32xf32>
      %73 = arith.mulf %62, %72 : vector<8x32xf32>
      %74 = arith.addf %71, %73 : vector<8x32xf32>
      %75 = math.tanh %74 : vector<8x32xf32>
      %cst_48 = arith.constant 1.000000e+00 : f32
      %76 = vector.broadcast %cst_48 : f32 to vector<8x32xf32>
      %77 = arith.subf %76, %70 : vector<8x32xf32>
      %78 = arith.mulf %77, %75 : vector<8x32xf32>
      %79 = arith.mulf %70, %11 : vector<8x32xf32>
      %80 = arith.addf %78, %79 : vector<8x32xf32>
      %c0_49 = arith.constant 0 : index
      %c0_50 = arith.constant 0 : index
      %81 = vector.load %arg16[%c0_49, %c0_50] : memref<8x32xf32, #tpu.memory_space<vmem>>, vector<8x32xf32>
      tpu.vector_store %arg16[%c0_49, %c0_50], %80 {strides = array<i32>} : memref<8x32xf32, #tpu.memory_space<vmem>>, vector<8x32xf32>,
      %82 = tpu.concatenate %80, %43, %12 in 1 : vector<8x32xf32>, vector<8x64xf32>, vector<8x16xf32> -> vector<8x112xf32>
      %c0_51 = arith.constant 0 : index
      %c0_52 = arith.constant 0 : index
      %83 = vector.load %arg18[%c0_51, %c0_52] : memref<8x112xf32, #tpu.memory_space<vmem>>, vector<8x112xf32>
      tpu.vector_store %arg18[%c0_51, %c0_52], %82 {strides = array<i32>} : memref<8x112xf32, #tpu.memory_space<vmem>>, vector<8x112xf32>,
    } else {
    }
    %c0 = arith.constant 0 : index
    %c0_1 = arith.constant 0 : index
    %3 = vector.load %arg18[%c0, %c0_1] : memref<8x112xf32, #tpu.memory_space<vmem>>, vector<8x112xf32>
    %c0_2 = arith.constant 0 : index
    %c0_3 = arith.constant 0 : index
    %4 = vector.load %arg13[%c0_2, %c0_3] : memref<112x128xf32, #tpu.memory_space<vmem>>, vector<112x128xf32>
    %cst = arith.constant dense<0.000000e+00> : vector<8x128xf32>
    %5 = tpu.matmul %3, %4, %cst {dimension_numbers = #tpu.dot_dimension_numbers<[1], [0], [0], [1], [0, 0, 1, 1], [], []>} : vector<8x112xf32>, vector<112x128xf32>, vector<8x128xf32> -> vector<8x128xf32>
    %c0_4 = arith.constant 0 : index
    %c0_5 = arith.constant 0 : index
    %6 = vector.load %arg14[%c0_4, %c0_5] : memref<1x128xf32, #tpu.memory_space<vmem>>, vector<1x128xf32>
    %7 = vector.broadcast %6 : vector<1x128xf32> to vector<8x128xf32>
    %8 = arith.addf %5, %7 : vector<8x128xf32>
    %c0_6 = arith.constant 0 : index
    %c0_7 = arith.constant 0 : index
    %9 = vector.load %arg15[%c0_6, %c0_7] : memref<8x128xf32, #tpu.memory_space<vmem>>, vector<8x128xf32>
    tpu.vector_store %arg15[%c0_6, %c0_7], %8 {strides = array<i32>} : memref<8x128xf32, #tpu.memory_space<vmem>>, vector<8x128xf32>,
    return
  }
  func.func @transform_0(%arg0: i32, %arg1: i32) -> (i32, i32, i32) {
    %c0_i32 = arith.constant 0 : i32
    %c0_i32_0 = arith.constant 0 : i32
    %c0_i32_1 = arith.constant 0 : i32
    return %arg0, %c0_i32, %c0_i32_0 : i32, i32, i32
  }
  func.func @transform_1(%arg0: i32, %arg1: i32) -> (i32, i32) {
    %c0_i32 = arith.constant 0 : i32
    %c0_i32_0 = arith.constant 0 : i32
    return %arg0, %c0_i32 : i32, i32
  }
  func.func @transform_2(%arg0: i32, %arg1: i32) -> (i32, i32, i32) {
    %c0_i32 = arith.constant 0 : i32
    %c0_i32_0 = arith.constant 0 : i32
    %c0_i32_1 = arith.constant 0 : i32
    return %arg0, %c0_i32, %c0_i32_0 : i32, i32, i32
  }
  func.func @transform_3(%arg0: i32, %arg1: i32) -> (i32, i32) {
    %c0_i32 = arith.constant 0 : i32
    %c0_i32_0 = arith.constant 0 : i32
    return %arg0, %c0_i32 : i32, i32
  }
  func.func @transform_4(%arg0: i32, %arg1: i32) -> (i32, i32, i32) {
    %c0_i32 = arith.constant 0 : i32
    %c0_i32_0 = arith.constant 0 : i32
    %c0_i32_1 = arith.constant 0 : i32
    return %arg0, %c0_i32, %c0_i32_0 : i32, i32, i32
  }
  func.func @transform_5(%arg0: i32, %arg1: i32) -> (i32, i32) {
    %c0_i32 = arith.constant 0 : i32
    %c0_i32_0 = arith.constant 0 : i32
    %c0_i32_1 = arith.constant 0 : i32
    return %c0_i32, %c0_i32_0 : i32, i32
  }
  func.func @transform_6(%arg0: i32, %arg1: i32) -> (i32, i32, i32) {
    %c0_i32 = arith.constant 0 : i32
    %c0_i32_0 = arith.constant 0 : i32
    %c0_i32_1 = arith.constant 0 : i32
    %c0_i32_2 = arith.constant 0 : i32
    return %c0_i32, %c0_i32_0, %c0_i32_1 : i32, i32, i32
  }
  func.func @transform_7(%arg0: i32, %arg1: i32) -> (i32, i32) {
    %c0_i32 = arith.constant 0 : i32
    %c0_i32_0 = arith.constant 0 : i32
    %c0_i32_1 = arith.constant 0 : i32
    return %c0_i32, %c0_i32_0 : i32, i32
  }
  func.func @transform_8(%arg0: i32, %arg1: i32) -> (i32, i32) {
    %c0_i32 = arith.constant 0 : i32
    %c0_i32_0 = arith.constant 0 : i32
    %c0_i32_1 = arith.constant 0 : i32
    return %c0_i32, %c0_i32_0 : i32, i32
  }
  func.func @transform_9(%arg0: i32, %arg1: i32) -> (i32, i32) {
    %c0_i32 = arith.constant 0 : i32
    %c0_i32_0 = arith.constant 0 : i32
    %c0_i32_1 = arith.constant 0 : i32
    return %c0_i32, %c0_i32_0 : i32, i32
  }
  func.func @transform_10(%arg0: i32, %arg1: i32) -> (i32, i32) {
    %c0_i32 = arith.constant 0 : i32
    %c0_i32_0 = arith.constant 0 : i32
    %c0_i32_1 = arith.constant 0 : i32
    return %c0_i32, %c0_i32_0 : i32, i32
  }
  func.func @transform_11(%arg0: i32, %arg1: i32) -> (i32, i32) {
    %c0_i32 = arith.constant 0 : i32
    %c0_i32_0 = arith.constant 0 : i32
    return %c0_i32, %arg1 : i32, i32
  }
  func.func @transform_12(%arg0: i32, %arg1: i32) -> (i32, i32) {
    %c0_i32 = arith.constant 0 : i32
    %c0_i32_0 = arith.constant 0 : i32
    return %c0_i32, %arg1 : i32, i32
  }
  func.func @transform_13(%arg0: i32, %arg1: i32) -> (i32, i32) {
    %c0_i32 = arith.constant 0 : i32
    return %arg0, %arg1 : i32, i32
  }
  func.func @transform_14(%arg0: i32, %arg1: i32) -> (i32, i32) {
    %c0_i32 = arith.constant 0 : i32
    %c0_i32_0 = arith.constant 0 : i32
    return %arg0, %c0_i32 : i32, i32
  }
  func.func @transform_15(%arg0: i32, %arg1: i32) -> (i32, i32, i32) {
    %c0_i32 = arith.constant 0 : i32
    %c0_i32_0 = arith.constant 0 : i32
    %c0_i32_1 = arith.constant 0 : i32
    return %arg0, %c0_i32, %c0_i32_0 : i32, i32, i32
  }
}

</mosaic_0001>

<bundles_post_ra>
// kernel: tpu_custom_call.1
= control target key start
LH: loop header
LB: loop body
LE: loop exit
PB: predicated region body
PF: predicated region fallthrough
CT: control target
= control target key end

     0   :  { %s3224_s0 = inlined_call_operand.vmem [shape: f32[8,8,64], index: 0, kind: input, shape index: {}]   ;;  %s3225_s1 = inlined_call_operand.hbm [shape: f32[8,32], index: 1, kind: input, shape index: {}]   ;;  %s3226_s2 = inlined_call_operand.vmem [shape: s32[8,8,1], index: 2, kind: input, shape index: {}]   ;;  %s3227_s3 = inlined_call_operand.hbm [shape: f32[8,16], index: 3, kind: input, shape index: {}]   ;;  %s3228_s4 = inlined_call_operand.hbm [shape: f32[8,1,32], index: 4, kind: input, shape index: {}]   ;;  %s3229_s5 = inlined_call_operand.vmem [shape: f32[64,32], index: 5, kind: input, shape index: {}]   ;;  %s3230_s6 = inlined_call_operand.vmem [shape: f32[1,1,32], index: 6, kind: input, shape index: {}]   ;;  %s3231_s7 = inlined_call_operand.vmem [shape: f32[80,96], index: 7, kind: input, shape index: {}]   ;;  %s3232_s8 = inlined_call_operand.hbm [shape: f32[32,96], index: 8, kind: input, shape index: {}]   ;;  %s3233_s9 = inlined_call_operand.vmem [shape: f32[1,96], index: 9, kind: input, shape index: {}]   ;;  %s3234_s10 = inlined_call_operand.vmem [shape: f32[1,96], index: 10, kind: input, shape index: {}]   ;;  %s3235_s11 = inlined_call_operand.hbm [shape: f32[112,256], index: 11, kind: input, shape index: {}]   ;;  %s3236_s12 = inlined_call_operand.vmem [shape: f32[1,256], index: 12, kind: input, shape index: {}]   ;;  %s3237_s13 = inlined_call_operand.hbm [shape: f32[8,256], index: 13, kind: output, shape index: {0}]   ;;  %s3238_s14 = inlined_call_operand.hbm [shape: f32[8,32], index: 14, kind: output, shape index: {1}]   ;;  %s3239_s15 = inlined_call_operand.vmem [shape: f32[8,8,1], index: 15, kind: output, shape index: {2}]  }
   0x1   :  { %3255 = sst [smem:[#allocation24_spill]] %s3224_s0 }
   0x2   :  { %3256 = sst [smem:[#allocation25_spill]] %s3225_s1 }
   0x3   :  { %3257 = sst [smem:[#allocation26_spill]] %s3226_s2 }
   0x4   :  { %3258 = sst [smem:[#allocation27_spill]] %s3227_s3 }
   0x5   :  { %3259 = sst [smem:[#allocation28_spill]] %s3230_s6 }
   0x6   :  { %3260 = sst [smem:[#allocation29_spill]] %s3231_s7 }
   0x7   :  { %3261 = sst [smem:[#allocation30_spill]] %s3233_s9 }
   0x8   :  { %3262 = sst [smem:[#allocation31_spill]] %s3234_s10 }
   0x9   :  { %3263 = sst [smem:[#allocation32_spill]] %s3237_s13 }
   0xa   :  { %3264 = sst [smem:[#allocation33_spill]] %s3238_s14 }
   0xb   :  { %3265 = sst [smem:[#allocation34_spill]] %s3239_s15 }
   0xc   :  { %21 = vsyncpa [#allocation4], 0 }
   0xd   :  { %22 = vsyncpa [#allocation7], 0 }
   0xe   :  { %23 = vsyncpa [#allocation10], 0 }
   0xf   :  { %24 = vsyncpa [#allocation5], 0 }
  0x10   :  { %26 = vsyncpa [#allocation5 + $0x1], 0 }
  0x11   :  { %27 = vsyncpa [#allocation14], 0  ;;  %s2613_s18 = smov 0   ;;  %s2615_s19 = smov 0  }
  0x12   :  { %s2617_s20 = smov 0   ;;  %s2619_s21 = smov 0  }
  0x13   :  { %s2621_s22 = smov 0   ;;  %s2623_s23 = smov 0  }
  0x14 LB: > { %3266 = sst [smem:[#allocation21_spill]] %s2488_s18  ;;  %s2644_s24 = sadd.s32 4294967295, %s2508_s23   ;;  %s2508_s23 = sphi %s2623_s23, %s33_s23   ;;  %s2504_s22 = sphi %s2621_s22, %s3314_s22   ;;  %s2500_s21 = sphi %s2619_s21, %s3313_s21   ;;  %s2496_s20 = sphi %s2617_s20, %s3312_s20   ;;  %s2492_s19 = sphi %s2615_s19, %s3311_s19   ;;  %s2488_s18 = sphi %s2613_s18, %s3310_s18  }
  0x15   : > { %s1811_s25 = sadd.s32 4294967294, %s2508_s23   ;;  %p315_p0 = scmp.ne.s32.totalorder %s2496_s20, %s2492_s19 }
  0x16   : > { %p316_p1 = scmp.eq.s32.totalorder %s2508_s23, 0  ;;  %p321_p2 = scmp.ne.s32.totalorder %s2492_s19, %s2488_s18 }
  0x17   : > { %p3250_p3 = scmp.eq.s32.totalorder %s2644_s24, 0  ;;  %p3240_p5 = scmp.eq.s32.totalorder %s2644_s24, 1 }
  0x18   : > { %p2653_p4 = por %p316_p1, %p315_p0  ;;  %p379_p7 = scmp.eq.s32.totalorder %s1811_s25, 1 }
  0x19   : > { %p2660_p6 = por %p3250_p3, %p321_p2  ;;  %p2666_p8 = por %p3240_p5, %p315_p0 }
  0x1a   : > { %p1812_p9 = scmp.ge.s32.totalorder %s2508_s23, 1  ;;  %p2671_p10 = por %p379_p7, %p321_p2 }
  0x1b   : > { %s3268_s27 = scalar_select %p2660_p6, 1, 0 }
  0x1c   : > { %s3269_s28 = scalar_select %p2666_p8, 1, 0 }
  0x1d   : > { %s3271_s29 = scalar_select %p2671_p10, 1, 0 }
  0x1e   : > { %3270 = sst [smem:[#allocation22_spill]] %s3269_s28  ;;  %p438_p11 = scmp.lt.s32.totalorder %s2508_s23, 3 }
  0x1f   : > { %3272 = sst [smem:[#allocation23_spill]] %s3271_s29  ;;  %s2510_s16 = smov [#allocation3]  }
  0x20   : > { %p2676_p12 = pnand %p1812_p9, %p438_p11  ;;  %s462_s17 = sshll.u32 %s2510_s16, 4  ;;  %s463_s17 = int_to_ptr.vmem [resolvable:$true] %s462_s17 }
  0x21   : > { %p2109_p1 = scmp.lt.s32.totalorder %s2508_s23, 2  ;;  %s2511_s18 = smov [#allocation6]  }
  0x22   : > { %s3273_s30 = scalar_select %p2676_p12, 1, 0 }
  0x23   : > { %p2084_p0 = pneg %p2676_p12  ;;  %p2692_p2 = pnand %p2109_p1, %p2653_p4 }
  0x24   : > { %s484_s13 = sshll.u32 %s2511_s18, 4  ;;  %s2512_s28 = smov [#allocation8]   ;;  %s485_s13 = int_to_ptr.vmem [resolvable:$true] %s484_s13 }
  0x25   : > { %p2686_p5 = pnand %p2084_p0, %p3250_p3  ;;  %s497_s16 = sshll.u32 %s2512_s28, 4  ;;  %s2720_s16 = int_to_ptr.vmem [resolvable:$true] %s497_s16 }
  0x26   : > { %s3275_s29 = scalar_select %p2692_p2, 1, 0 }
  0x27   : > { %s3276_s1 = sld [smem:[#allocation25_spill]]  ;;  %p2704_p9 = pneg %p2686_p5 }
  0x2d   : > { %s2242_s10 = scalar_lea.hbm %s3276_s1, 128 }
  0x2e   : > { %p2243_p7 = scmp.ne.s32.totalorder %s3276_s1, %s2242_s10  ;;  %p2249_p0 = scmp.lt.u32.totalorder %s2242_s10, %s3276_s1 }
  0x30   : > { %p2245_p4 = pnand %p2704_p9, %p2243_p7 }
  0x32   : > { %p2246_p11 = pneg %p2245_p4 }
  0x34   : > { %p2251_p1 = pnand %p2249_p0, %p2246_p11 }
  0x36   : > { %2254 = shalt.err (!%p2251_p1)
}
  0x37   : > { %s2255_s9 = scalar_lea.vmem %s463_s17, 128  ;;  %p2263_p8 = scmp.lt.s32.totalorder %s463_s17, %s463_s17 }
  0x38   : > { %p2256_p13 = scmp.ne.s32.totalorder %s463_s17, %s2255_s9  ;;  %p2264_p6 = scmp.lt.s32.totalorder %s2255_s9, %s2255_s9 }
  0x3a   : > { %p2258_p3 = pnand %p2256_p13, %p2704_p9  ;;  %p2265_p12 = por %p2264_p6, %p2263_p8 }
  0x3c   : > { %p2259_p10 = pneg %p2258_p3 }
  0x3e   : > { %p2266_p2 = pnand %p2265_p12, %p2259_p10 }
  0x40   : > { %2269 = shalt.err (!%p2266_p2)
}
  0x41   : > { %2087 = dma.hbm_to_vmem [thread:$0]  (!%p2686_p5), %s3276_s1, 128, %s463_s17, [#allocation4]  }
  0x42   : > { %s3278_s3 = sld [smem:[#allocation27_spill]] }
  0x48   : > { %s2270_s15 = scalar_lea.hbm %s3278_s3, 128 }
  0x49   : > { %p2271_p3 = scmp.ne.s32.totalorder %s3278_s3, %s2270_s15  ;;  %p2277_p10 = scmp.lt.u32.totalorder %s2270_s15, %s3278_s3 }
  0x4b   : > { %p2273_p6 = pnand %p2271_p3, %p2704_p9 }
  0x4d   : > { %p2274_p8 = pneg %p2273_p6 }
  0x4f   : > { %p2279_p12 = pnand %p2277_p10, %p2274_p8 }
  0x51   : > { %2282 = shalt.err (!%p2279_p12)
}
  0x52   : > { %s2283_s17 = scalar_lea.vmem %s485_s13, 128  ;;  %p2291_p4 = scmp.lt.s32.totalorder %s485_s13, %s485_s13 }
  0x53   : > { %p2284_p13 = scmp.ne.s32.totalorder %s485_s13, %s2283_s17  ;;  %p2292_p11 = scmp.lt.s32.totalorder %s2283_s17, %s2283_s17 }
  0x55   : > { %p2286_p2 = pnand %p2284_p13, %p2704_p9  ;;  %p2293_p0 = por %p2292_p11, %p2291_p4 }
  0x57   : > { %p2287_p7 = pneg %p2286_p2 }
  0x59   : > { %p2294_p1 = pnand %p2293_p0, %p2287_p7 }
  0x5b   : > { %2297 = shalt.err (!%p2294_p1)
}
  0x5c   : > { %2090 = dma.hbm_to_vmem [thread:$0]  (!%p2686_p5), %s3278_s3, 128, %s485_s13, [#allocation7]  }
  0x5d   : > { %s2298_s10 = scalar_lea.hbm %s3228_s4, 128 }
  0x5e   : > { %p2299_p3 = scmp.ne.s32.totalorder %s3228_s4, %s2298_s10  ;;  %p2305_p10 = scmp.lt.u32.totalorder %s2298_s10, %s3228_s4 }
  0x60   : > { %p2301_p6 = pnand %p2299_p3, %p2704_p9 }
  0x62   : > { %p2302_p8 = pneg %p2301_p6 }
  0x64   : > { %p2307_p12 = pnand %p2305_p10, %p2302_p8 }
  0x66   : > { %2310 = shalt.err (!%p2307_p12)
}
  0x67   : > { %s2311_s13 = scalar_lea.vmem %s2720_s16, 128  ;;  %p2319_p4 = scmp.lt.s32.totalorder %s2720_s16, %s2720_s16 }
  0x68   : > { %p2312_p13 = scmp.ne.s32.totalorder %s2720_s16, %s2311_s13  ;;  %p2320_p11 = scmp.lt.s32.totalorder %s2311_s13, %s2311_s13 }
  0x6a   : > { %p2314_p2 = pnand %p2312_p13, %p2704_p9  ;;  %p2321_p0 = por %p2320_p11, %p2319_p4 }
  0x6c   : > { %p2315_p7 = pneg %p2314_p2 }
  0x6e   : > { %p2322_p1 = pnand %p2321_p0, %p2315_p7 }
  0x70   : > { %2325 = shalt.err (!%p2322_p1)
}
  0x71   : > { %s2513_s17 = smov 16   ;;  %s2514_s7 = smov 1  }
  0x72   : > { %2093 = dma.hbm_to_vmem [thread:$0]  (!%p2686_p5), %s3228_s4, 128, %s2720_s16, [#allocation7], %s2513_s17, %s2513_s17, %s2514_s7  }
  0x73   : > { %s2515_s2 = smov [#allocation9]   ;;  %s2326_s18 = scalar_lea.hbm %s3232_s8, 512 }
  0x74   : > { %s519_s10 = sshll.u32 %s2515_s2, 4  ;;  %p2327_p3 = scmp.ne.s32.totalorder %s3232_s8, %s2326_s18  ;;  %s520_s10 = int_to_ptr.vmem [resolvable:$true] %s519_s10 }
  0x75   : > { %p2333_p10 = scmp.lt.u32.totalorder %s2326_s18, %s3232_s8 }
  0x76   : > { %p2329_p6 = pnand %p2327_p3, %p2704_p9 }
  0x78   : > { %p2330_p8 = pneg %p2329_p6 }
  0x7a   : > { %p2335_p12 = pnand %p2333_p10, %p2330_p8 }
  0x7c   : > { %2338 = shalt.err (!%p2335_p12)
}
  0x7d   : > { %s2339_s16 = scalar_lea.vmem %s520_s10, 512  ;;  %p2347_p4 = scmp.lt.s32.totalorder %s520_s10, %s520_s10 }
  0x7e   : > { %p2340_p13 = scmp.ne.s32.totalorder %s520_s10, %s2339_s16  ;;  %p2348_p11 = scmp.lt.s32.totalorder %s2339_s16, %s2339_s16 }
  0x80   : > { %p2342_p2 = pnand %p2340_p13, %p2704_p9  ;;  %p2349_p0 = por %p2348_p11, %p2347_p4 }
  0x82   : > { %p2343_p7 = pneg %p2342_p2 }
  0x84   : > { %p2350_p1 = pnand %p2349_p0, %p2343_p7 }
  0x86   : > { %2353 = shalt.err (!%p2350_p1)
}
  0x87   : > { %s2516_s17 = smov 128   ;;  %s2517_s1 = smov 8  }
  0x88   : > { %2096 = dma.hbm_to_vmem [thread:$0]  (!%p2686_p5), %s3232_s8, 512, %s520_s10, [#allocation10], %s2516_s17, %s2516_s17, %s2517_s1  }
  0x89   : > { %s42_s7 = sadd.s32 1, %s2504_s22  ;;  %s308_s14 = sadd.s32 1, %s2496_s20 }
  0x8a   : > { %p43_p9 = scmp.ge.s32.totalorder %s42_s7, 2  ;;  %s539_s6 = sand.u32 1, %s2508_s23  }
  0x8b   : > { %s541_s2 = sand.u32 1, %s2496_s20   ;;  %s1820_s15 = sshll.u32 %s2504_s22, 7 }
  0x8c   : > { %s3316_s7 = smov (%p43_p9, %s42_s7), 0  ;;  %s2058_s28 = smul.u32 112, %s541_s2 }
  0x8d   : > { %s305_s25 = ssub.s32 %s2504_s22, %s3316_s7  ;;  %s2796_s13 = scalar_lea.hbm %s3235_s11, %s1820_s15 }
  0x8e   : > { %p306_p5 = scmp.eq.s32.totalorder %s305_s25, 0  ;;  %s543_s10 = scalar_lea.vmem [#allocation11], %s2058_s28 }
  0x8f   : > { %s549_s16 = sshll.u32 %s543_s10, 4  ;;  %s2803_s26 = scalar_lea.sflag [#allocation4], %s539_s6  ;;  %s2801_s16 = int_to_ptr.vmem [resolvable:$true] %s549_s16 }
  0x90   : > { %s2799_s3 = scalar_select %p306_p5, %s2496_s20, %s308_s14  }
  0x91   : > { %s2354_s2 = scalar_lea.hbm %s2796_s13, 1792  ;;  %p3279_p6 = scmp.ne.s32.totalorder %s3275_s29, 0 }
  0x92   : > { %p2355_p3 = scmp.ne.s32.totalorder %s2796_s13, %s2354_s2  ;;  %s2359_s25 = scalar_lea.hbm %s3235_s11, 3584 }
  0x93   : > { %p2356_p8 = pneg %p3279_p6  ;;  %p2360_p13 = scmp.lt.u32.totalorder %s2796_s13, %s3235_s11 }
  0x94   : > { %p2361_p2 = scmp.lt.u32.totalorder %s2359_s25, %s2354_s2  ;;  %p2363_p4 = scmp.lt.u32.totalorder %s2354_s2, %s2796_s13 }
  0x95   : > { %p2357_p10 = pnand %p2356_p8, %p2355_p3 }
  0x96   : > { %p2362_p7 = por %p2361_p2, %p2360_p13 }
  0x97   : > { %p2358_p12 = pneg %p2357_p10 }
  0x98   : > { %p2364_p11 = por %p2363_p4, %p2362_p7 }
  0x9a   : > { %p2365_p0 = pnand %p2364_p11, %p2358_p12 }
  0x9c   : > { %2368 = shalt.err (!%p2365_p0)
}
  0x9d   : > { %s2369_s14 = scalar_lea.vmem %s2801_s16, 1792  ;;  %s2518_s6 = smov [#allocation11]  }
  0x9e   : > { %p2370_p1 = scmp.ne.s32.totalorder %s2801_s16, %s2369_s14  ;;  %s2374_s10 = sshll.u32 %s2518_s6, 4  ;;  %s2375_s10 = int_to_ptr.vmem [resolvable:$false] %s2374_s10 }
  0x9f   : > { %s2376_s15 = scalar_lea.vmem %s2375_s10, 3584  ;;  %p2377_p3 = scmp.lt.s32.totalorder %s2801_s16, %s2375_s10 }
  0xa0   : > { %p2372_p9 = pnand %p2370_p1, %p2356_p8  ;;  %p2378_p10 = scmp.lt.s32.totalorder %s2376_s15, %s2369_s14 }
  0xa2   : > { %p2373_p5 = pneg %p2372_p9  ;;  %p2379_p13 = por %p2378_p10, %p2377_p3 }
  0xa4   : > { %p2380_p2 = pnand %p2379_p13, %p2373_p5 }
  0xa6   : > { %2383 = shalt.err (!%p2380_p2)
}
  0xa7   : > { %s2519_s2 = smov 256   ;;  %p3280_p8 = scmp.ne.s32.totalorder %s3273_s30, 0 }
  0xa8   : > { %2100 = dma.hbm_to_vmem [thread:$0]  (!%p3279_p6), %s2796_s13, 1792, %s2801_s16, %s2803_s26, %s2519_s2, %s2516_s17, %s2517_s1  }
  0xa9   : > { %567 = sbr.rel (%p3280_p8) target bundleno = 1893 (0x765), region = 72  ;;  %p3281_p12 = scmp.eq.s32.totalorder (!%p3280_p8), %s2644_s24, 0 }
  0xb0   : > { %2463 = dma.done.wait (%p3281_p12), [#allocation4], 128   ;;  %p3282_p7 = pmov %p3281_p12 }
  0xb2   : > { %2465 = vsyncadd (%p3282_p7), [#allocation4], 4294967168  ;;  %p3283_p4 = pmov %p3282_p7 }
  0xb4   : > { %2467 = dma.done.wait (%p3283_p4), [#allocation7], 256   ;;  %p3284_p11 = pmov %p3283_p4 }
  0xb5   : > { %p3285_p0 = pmov %p3283_p4 }
  0xb6   : > { %2469 = vsyncadd (%p3284_p11), [#allocation7], 4294967040 }
  0xb7   : > { %2471 = dma.done.wait (%p3285_p0), [#allocation10], 512   ;;  %p3286_p6 = pmov %p3285_p0 }
  0xb8   : > { %s585_s29 = sand.u32 1, %s2644_s24   ;;  %s2849_s30 = sand.u32 1, %s2492_s19  }
  0xb9   : > { %2473 = vsyncadd (%p3286_p6), [#allocation10], 4294966784  ;;  %s2059_s17 = smul.u32 112, %s2849_s30  ;;  %s586_s1 = scalar_lea.sflag [#allocation4], %s585_s29 }
  0xba   : > { %p3287_p1 = scmp.ne.s32.totalorder %s3268_s27, 0 }
  0xbb   : > { %s2852_s13 = scalar_lea.vmem [#allocation11], %s2059_s17 }
  0xbc   : > { %2475 = dma.done.wait (%p3287_p1), %s586_s1, 1792  }
  0xbd   : > { %2477 = vsyncadd (%p3287_p1), %s586_s1, 4294965504  ;;  %s1826_s16 = sshll.u32 %s2849_s30, 3  ;;  %p667_p9 = scmp.lt.s32.totalorder %s2500_s21, 1 }
  0xbe   : > { %s2867_s9 = scalar_lea.vmem [#allocation12], %s1826_s16  ;;  %p1827_p5 = scmp.ne.s32.totalorder %s2500_s21, 0 }
  0xbf   : > { %s2861_s26 = scalar_select %p667_p9, %s2500_s21, 1 }
  0xc0   : > { %679 = sbr.rel (%p1827_p5) target bundleno = 1630 (0x65e), region = 96  ;;  %v690_v0 = vld [vmem:[%s3229_s5] sm:$0xff] (!%p1827_p5)  ;;  %v691_v1 = vld [vmem:[%s3229_s5 + $0x8] sm:$0xff] (!%p1827_p5)  ;;  %v692_v2 = vld [vmem:[%s3229_s5 + $0x10] sm:$0xff] (!%p1827_p5)  ;;  %vm698_vm0 = vcmask (!%p1827_p5), 523264   ;;  %s3288_s0 = sld [smem:[#allocation24_spill]] (!%p1827_p5) }
  0xc1   : > { %v2000_v3 = vpack.c.bf16 (!%p1827_p5), %v691_v1, %v690_v0  ;;  %v693_v4 = vld [vmem:[%s3229_s5 + $0x18] sm:$0xff] (!%p1827_p5)  ;;  %v694_v6 = vld [vmem:[%s3229_s5 + $0x20] sm:$0xff] (!%p1827_p5)  ;;  %v695_v7 = vld [vmem:[%s3229_s5 + $0x28] sm:$0xff] (!%p1827_p5)  ;;  %s3289_s18 = sld [smem:[#allocation28_spill]] (!%p1827_p5)  ;;  %vm915_vm1 = vcmask (!%p1827_p5), 261120   ;;  %s3290_s27 = sld [smem:[#allocation26_spill]] (!%p1827_p5) }
  0xc2   : > { %v2004_v5 = vpack.c.bf16 (!%p1827_p5), %v693_v4, %v692_v2  ;;  %v2008_v9 = vpack.c.bf16 (!%p1827_p5), %v695_v7, %v694_v6  ;;  %v696_v10 = vld [vmem:[%s3229_s5 + $0x30] sm:$0xff] (!%p1827_p5)  ;;  %v697_v11 = vld [vmem:[%s3229_s5 + $0x38] sm:$0xff] (!%p1827_p5)  ;;  %vm964_vm3 = vcmask (!%p1827_p5), 7168   ;;  %s3291_s17 = sld [smem:[#allocation34_spill]] (!%p1827_p5)  ;;  %s3292_s10 = sld [smem:[#allocation29_spill]] (!%p1827_p5)  ;;  %vm1237_vm11 = vcmask (!%p1827_p5), 1041409  }
  0xc3   : > { %2001 = vmatprep.subr.bf16.mxu0 (!%p1827_p5), %v2000_v3  ;;  %v2012_v12 = vpack.c.bf16 (!%p1827_p5), %v697_v11, %v696_v10  ;;  %v1837_v20 = vld [vmem:[#allocation8 + $0x1] ss:$0 sm:$0xff] (!%p1827_p5)  ;;  %v1836_v21 = vld [vmem:[#allocation8] ss:$0 sm:$0xff] (!%p1827_p5)  ;;  %v1839_v26 = vld [vmem:[#allocation8 + $0x3] ss:$0 sm:$0xff] (!%p1827_p5) }
  0xc4   : > { %2003 = vmatpush3.bf16.msra.mxu0 (!%p1827_p5), %v2000_v3  ;;  %v1838_v27 = vld [vmem:[#allocation8 + $0x2] ss:$0 sm:$0xff] (!%p1827_p5)  ;;  %v1841_v32 = vld [vmem:[#allocation8 + $0x5] ss:$0 sm:$0xff] (!%p1827_p5)  ;;  %v1840_v33 = vld [vmem:[#allocation8 + $0x4] ss:$0 sm:$0xff] (!%p1827_p5) }
  0xc5   : > { %2005 = vmatprep.subr.bf16.mxu0 (!%p1827_p5), %v2004_v5  ;;  %v1843_v38 = vld [vmem:[#allocation8 + $0x7] ss:$0 sm:$0xff] (!%p1827_p5)  ;;  %v1842_v39 = vld [vmem:[#allocation8 + $0x6] ss:$0 sm:$0xff] (!%p1827_p5)  ;;  %vm1239_vm12 = vcmask (!%p1827_p5), 1042434   ;;  %vm2522_vm13 = vmmov (!%p1827_p5), 0  }
  0xc6   : > { %v2891_v8 = vld [vmem:[%s3288_s0] sm:$0xff] (!%p1827_p5)  ;;  %v2904_v13 = vld [vmem:[%s3288_s0 + $0x8] sm:$0xff] (!%p1827_p5)  ;;  %v2909_v14 = vld [vmem:[%s3288_s0 + $0x10] sm:$0xff] (!%p1827_p5)  ;;  %vm1241_vm14 = vcmask (!%p1827_p5), 1043459   ;;  %vm1243_vm15 = vcmask (!%p1827_p5), 1044484   ;;  %s2524_s15 = smov (!%p1827_p5), 16  }
  0xc7   : > { %1923 = vmatprep.mubr.msk.f32.mxu0 %vm698_vm0, %v2891_v8  ;;  %v2918_v15 = vld [vmem:[%s3288_s0 + $0x18] sm:$0xff]  ;;  %v2923_v16 = vld [vmem:[%s3288_s0 + $0x20] sm:$0xff]  ;;  %v2932_v17 = vld [vmem:[%s3288_s0 + $0x28] sm:$0xff]  ;;  %s3293_s1 = sld [smem:[#allocation31_spill]]  ;;  %s2525_s16 = smov 64  }
  0xc8   : > { %2007 = vmatpush3.bf16.msra.mxu0 %v2004_v5  ;;  %v2937_v18 = vld [vmem:[%s3288_s0 + $0x30] sm:$0xff]  ;;  %v2946_v19 = vld [vmem:[%s3288_s0 + $0x38] sm:$0xff]  ;;  %v1844_v40 = vld [vmem:[%s3289_s18] ss:$0 sm:$0xff]  ;;  %v2520_v5 = vmov 0   ;;  %s3294_s14 = sld [smem:[#allocation30_spill]] }
  0xc9   : > { %2009 = vmatprep.subr.bf16.mxu0 %v2008_v9  ;;  %2187 = vset.pattern.permute.xlu1 %v2520_v5  ;;  %v941_v6 = vld [vmem:[%s3290_s27 + $0x8] sm:$0xff]  ;;  %v940_v7 = vld [vmem:[%s3290_s27] sm:$0xff]  ;;  %s2526_s6 = smov 32  }
  0xca   : > { %2186 = vset.pattern.permute.xlu0 %v2520_v5  ;;  %vm949_vm2 = vcmp.eq.s32.totalorder %v941_v6, 0  ;;  %vm948_vm4 = vcmp.eq.s32.totalorder %v940_v7, 0 }
  0xcc   : > { %2011 = vmatpush3.bf16.msra.mxu0 %v2008_v9  ;;  %v943_v9 = vld [vmem:[%s3290_s27 + $0x18] sm:$0xff] }
  0xcd   : > { %2013 = vmatprep.subr.bf16.mxu0 %v2012_v12  ;;  %vm951_vm5 = vcmp.eq.s32.totalorder %v943_v9, 0 }
  0xd0   : > { %2015 = vmatpush3.bf16.msra.mxu0 %v2012_v12 }
  0xd3   : > { %1924 = vmatmul.mubr.msk.f32.vlgmr.msra.gmra.mrb[0].mxu0 %vm698_vm0, %v2904_v13 }
  0xd4   : > { %1926 = vmatprep.mubr.msk.f32.mxu0 %vm698_vm0, %v2909_v14 }
  0xd7   : > { %1927 = vmatmul.mubr.msk.f32.gmra.mrb[2].mxu0 %vm698_vm0, %v2918_v15 }
  0xd8   : > { %1929 = vmatprep.mubr.msk.f32.mxu0 %vm698_vm0, %v2923_v16 }
  0xdb   : > { %1930 = vmatmul.mubr.msk.f32.gmra.mrb[4].mxu0 %vm698_vm0, %v2932_v17 }
  0xdc   : > { %1932 = vmatprep.mubr.msk.f32.mxu0 %vm698_vm0, %v2937_v18 }
  0xdf   : > { %1933 = vmatmul.mubr.msk.f32.gmra.mrb[6].mxu0 %vm698_vm0, %v2946_v19 }
 0x1a6   : > { %v1925_v22 = vpop.f32.mrb[0].mxu0 }
 0x1a7   : > { %v885_v23 = vadd.f32 %v1925_v22, %v1837_v20  ;;  %v789_v24 = vpop.f32.mrb[1].mxu0 }
 0x1a8   : > { %v884_v25 = vadd.f32 %v1836_v21, %v789_v24  ;;  %v942_v21 = vld [vmem:[%s3290_s27 + $0x10] sm:$0xff]  ;;  %v944_v24 = vld [vmem:[%s3290_s27 + $0x20] sm:$0xff] }
 0x1a9   : > { %2188 = vtanh.f32 %v885_v23  ;;  %vm950_vm6 = vcmp.eq.s32.totalorder %v942_v21, 0  ;;  %vm952_vm7 = vcmp.eq.s32.totalorder %v944_v24, 0 }
 0x1aa   : > { %2190 = vtanh.f32 %v884_v25  ;;  %v1928_v28 = vpop.f32.mrb[2].mxu0 }
 0x1ab   : > { %v887_v29 = vadd.f32 %v1928_v28, %v1839_v26  ;;  %v799_v30 = vpop.f32.mrb[3].mxu0 }
 0x1ac   : > { %v886_v31 = vadd.f32 %v1838_v27, %v799_v30 }
 0x1ad   : > { %2192 = vtanh.f32 %v887_v29 }
 0x1ae   : > { %2194 = vtanh.f32 %v886_v31  ;;  %v1931_v34 = vpop.f32.mrb[4].mxu0 }
 0x1af   : > { %v889_v35 = vadd.f32 %v1931_v34, %v1841_v32  ;;  %v809_v36 = vpop.f32.mrb[5].mxu0  ;;  %v946_v34 = vld [vmem:[%s3290_s27 + $0x30] sm:$0xff] }
 0x1b0   : > { %v888_v37 = vadd.f32 %v1840_v33, %v809_v36  ;;  %v945_v33 = vld [vmem:[%s3290_s27 + $0x28] sm:$0xff]  ;;  %vm954_vm9 = vcmp.eq.s32.totalorder %v946_v34, 0 }
 0x1b1   : > { %2196 = vtanh.f32 %v889_v35  ;;  %vm953_vm8 = vcmp.eq.s32.totalorder %v945_v33, 0 }
 0x1b2   : > { %2198 = vtanh.f32 %v888_v37  ;;  %v1934_v41 = vpop.f32.mrb[6].mxu0 }
 0x1b3   : > { %v2189_v42 = vpop.eup %2188  ;;  %v891_v43 = vadd.f32 %v1934_v41, %v1843_v38  ;;  %v819_v44 = vpop.f32.mrb[7].mxu0 }
 0x1b4   : > { %v2191_v45 = vpop.eup %2190  ;;  %v890_v46 = vadd.f32 %v1842_v39, %v819_v44  ;;  %v908_v47 = vmul.f32 %v2189_v42, %v1844_v40 }
 0x1b5   : > { %2200 = vtanh.f32 %v891_v43  ;;  %v907_v49 = vmul.f32 %v2191_v45, %v1844_v40 }
 0x1b6   : > { %2202 = vtanh.f32 %v890_v46  ;;  %v919_v48 = vsel %vm915_vm1, %v908_v47, 0.0  ;;  %v947_v47 = vld [vmem:[%s3290_s27 + $0x38] sm:$0xff] }
 0x1b7   : > { %v2193_v50 = vpop.eup %2192  ;;  %920 = vadd.xlane.f32.xlu0 %v919_v48  ;;  %v916_v53 = vsel %vm915_vm1, %v907_v49, 0.0  ;;  %vm955_vm10 = vcmp.eq.s32.totalorder %v947_v47, 0 }
 0x1b8   : > { %v2195_v51 = vpop.eup %2194  ;;  %v910_v52 = vmul.f32 %v2193_v50, %v1844_v40 }
 0x1b9   : > { %v909_v55 = vmul.f32 %v2195_v51, %v1844_v40 }
 0x1ba   : > { %v925_v54 = vsel %vm915_vm1, %v910_v52, 0.0 }
 0x1bb   : > { %v2197_v56 = vpop.eup %2196  ;;  %917 = vadd.xlane.f32.xlu0 %v916_v53  ;;  %926 = vadd.xlane.f32.xlu1 %v925_v54  ;;  %v922_v60 = vsel %vm915_vm1, %v909_v55, 0.0 }
 0x1bc   : > { %v2199_v57 = vpop.eup %2198  ;;  %v912_v58 = vmul.f32 %v2197_v56, %v1844_v40 }
 0x1bd   : > { %v911_v59 = vmul.f32 %v2199_v57, %v1844_v40 }
 0x1be   : > { %v931_v0 = vsel %vm915_vm1, %v912_v58, 0.0 }
 0x1bf   : > { %v2201_v61 = vpop.eup %2200  ;;  %923 = vadd.xlane.f32.xlu1 %v922_v60  ;;  %v928_v62 = vsel %vm915_vm1, %v911_v59, 0.0 }
 0x1c0   : > { %v2203_v63 = vpop.eup %2202  ;;  %929 = vadd.xlane.f32.xlu0 %v928_v62  ;;  %v914_v1 = vmul.f32 %v2201_v61, %v1844_v40 }
 0x1c1   : > { %v913_v2 = vmul.f32 %v2203_v63, %v1844_v40 }
 0x1c2   : > { %v937_v4 = vsel %vm915_vm1, %v914_v1, 0.0 }
 0x1c3   : > { %932 = vadd.xlane.f32.xlu1 %v931_v0  ;;  %v934_v3 = vsel %vm915_vm1, %v913_v2, 0.0 }
 0x1c4   : > { %935 = vadd.xlane.f32.xlu0 %v934_v3 }
 0x1c7   : > { %938 = vadd.xlane.f32.xlu1 %v937_v4 }
 0x244   : > { %v921_v10 = vpop.xlane.xlu0 %920 }
 0x245   : > { %v957_v11 = vsel %vm949_vm2, -1e+10, %v921_v10  ;;  %vm1247_vm2 = vcmask 1046534  }
 0x246   : > { %v972_v12 = vsel %vm964_vm3, %v957_v11, -inf }
 0x247   : > { %v973_v20 = vrot.slane %v972_v12, 4 }
 0x248   : > { %v918_v22 = vpop.xlane.xlu0 %917  ;;  %v927_v23 = vpop.xlane.xlu1 %926 }
 0x249   : > { %v974_v25 = vmax.f32 %v972_v12, %v973_v20  ;;  %v956_v26 = vsel %vm948_vm4, -1e+10, %v918_v22  ;;  %v959_v27 = vsel %vm951_vm5, -1e+10, %v927_v23  ;;  %vm1254_vm4 = vcmask 130048  }
 0x24a   : > { %v965_v28 = vsel %vm964_vm3, %v956_v26, -inf  ;;  %v986_v29 = vsel %vm964_vm3, %v959_v27, -inf  ;;  %vm1273_vm5 = vcmask 654336  }
 0x24b   : > { %v975_v30 = vrot.slane %v974_v25, 2  ;;  %v966_v31 = vrot.slane %v965_v28, 4  ;;  %v987_v32 = vrot.slane %v986_v29, 4 }
 0x24c   : > { %v924_v35 = vpop.xlane.xlu1 %923 }
 0x24d   : > { %v976_v36 = vmax.f32 %v974_v25, %v975_v30  ;;  %v967_v37 = vmax.f32 %v965_v28, %v966_v31  ;;  %v988_v38 = vmax.f32 %v986_v29, %v987_v32  ;;  %v958_v39 = vsel %vm950_vm6, -1e+10, %v924_v35  ;;  %v930_v40 = vpop.xlane.xlu0 %929 }
 0x24e   : > { %v979_v41 = vsel %vm964_vm3, %v958_v39, -inf  ;;  %v2986_v42 = vsel %vm952_vm7, -1e+10, %v930_v40  ;;  %vm1473_vm6 = vcmask 785408   ;;  %vm1475_vm7 = vcmask 916480  }
 0x24f   : > { %v977_v43 = vrot.slane %v976_v36, 1  ;;  %v968_v44 = vrot.slane %v967_v37, 2  ;;  %v989_v45 = vrot.slane %v988_v38, 2  ;;  %v980_v46 = vrot.slane %v979_v41, 4 }
 0x250   : > { %v993_v48 = vsel %vm964_vm3, %v2986_v42, -inf  ;;  %v933_v49 = vpop.xlane.xlu1 %932 }
 0x251   : > { %v978_v50 = vmax.f32 %v976_v36, %v977_v43  ;;  %v969_v51 = vmax.f32 %v967_v37, %v968_v44  ;;  %v990_v52 = vmax.f32 %v988_v38, %v989_v45  ;;  %v981_v53 = vmax.f32 %v979_v41, %v980_v46  ;;  %v936_v54 = vpop.xlane.xlu0 %935 }
 0x252   : > { %v994_v55 = vrot.slane %v993_v48, 4  ;;  %v961_v56 = vsel %vm953_vm8, -1e+10, %v933_v49  ;;  %v962_v57 = vsel %vm954_vm9, -1e+10, %v936_v54 }
 0x253   : > { %v1022_v58 = vsub.f32 %v957_v11, %v978_v50  ;;  %v970_v59 = vrot.slane %v969_v51, 1  ;;  %v991_v60 = vrot.slane %v990_v52, 1  ;;  %v982_v61 = vrot.slane %v981_v53, 2 }
 0x254   : > { %v995_v62 = vmax.f32 %v993_v48, %v994_v55  ;;  %v1000_v63 = vsel %vm964_vm3, %v961_v56, -inf  ;;  %v1007_v0 = vsel %vm964_vm3, %v962_v57, -inf  ;;  %v939_v1 = vpop.xlane.xlu1 %938 }
 0x255   : > { %v1031_v2 = vmul.f32 1.442695, %v1022_v58  ;;  %v971_v3 = vmax.f32 %v969_v51, %v970_v59  ;;  %v992_v4 = vmax.f32 %v990_v52, %v991_v60  ;;  %v983_v5 = vmax.f32 %v981_v53, %v982_v61 }
 0x256   : > { %v996_v6 = vrot.slane %v995_v62, 2  ;;  %v1001_v7 = vrot.slane %v1000_v63, 4  ;;  %v1008_v9 = vrot.slane %v1007_v0, 4  ;;  %v963_v10 = vsel %vm955_vm10, -1e+10, %v939_v1 }
 0x257   : > { %2204 = vpow2.f32 %v1031_v2  ;;  %v1021_v11 = vsub.f32 %v956_v26, %v971_v3  ;;  %v1024_v12 = vsub.f32 %v959_v27, %v992_v4  ;;  %v984_v20 = vrot.slane %v983_v5, 1 }
 0x258   : > { %v997_v21 = vmax.f32 %v995_v62, %v996_v6  ;;  %v1002_v22 = vmax.f32 %v1000_v63, %v1001_v7  ;;  %v1009_v23 = vmax.f32 %v1007_v0, %v1008_v9  ;;  %v1014_v24 = vsel %vm964_vm3, %v963_v10, -inf }
 0x259   : > { %v1029_v25 = vmul.f32 1.442695, %v1021_v11  ;;  %v1035_v28 = vmul.f32 1.442695, %v1024_v12  ;;  %v985_v29 = vmax.f32 %v983_v5, %v984_v20  ;;  %v1015_v30 = vrot.slane %v1014_v24, 4 }
 0x25a   : > { %v998_v31 = vrot.slane %v997_v21, 1  ;;  %v1003_v32 = vrot.slane %v1002_v22, 2  ;;  %v1010_v33 = vrot.slane %v1009_v23, 2 }
 0x25b   : > { %2206 = vpow2.f32 %v1029_v25  ;;  %v1023_v34 = vsub.f32 %v958_v39, %v985_v29  ;;  %v1016_v35 = vmax.f32 %v1014_v24, %v1015_v30 }
 0x25c   : > { %2208 = vpow2.f32 %v1035_v28  ;;  %v999_v36 = vmax.f32 %v997_v21, %v998_v31  ;;  %v1004_v26 = vmax.f32 %v1002_v22, %v1003_v32  ;;  %v1011_v27 = vmax.f32 %v1009_v23, %v1010_v33 }
 0x25d   : > { %v1033_v37 = vmul.f32 1.442695, %v1023_v34  ;;  %v1017_v38 = vrot.slane %v1016_v35, 2 }
 0x25e   : > { %v1025_v40 = vsub.f32 %v2986_v42, %v999_v36  ;;  %v1005_v41 = vrot.slane %v1004_v26, 1  ;;  %v1012_v43 = vrot.slane %v1011_v27, 1 }
 0x25f   : > { %2210 = vpow2.f32 %v1033_v37  ;;  %v1018_v44 = vmax.f32 %v1016_v35, %v1017_v38 }
 0x260   : > { %v1037_v45 = vmul.f32 1.442695, %v1025_v40  ;;  %v1006_v46 = vmax.f32 %v1004_v26, %v1005_v41  ;;  %v1013_v47 = vmax.f32 %v1011_v27, %v1012_v43 }
 0x261   : > { %v2998_v48 = vpop.eup %2204  ;;  %v1019_v49 = vrot.slane %v1018_v44, 1 }
 0x262   : > { %v1052_v39 = vsel %vm964_vm3, %v2998_v48, 0.0  ;;  %2212 = vpow2.f32 %v1037_v45  ;;  %v1026_v50 = vsub.f32 %v961_v56, %v1006_v46  ;;  %v1027_v51 = vsub.f32 %v962_v57, %v1013_v47 }
 0x263   : > { %v1053_v52 = vrot.slane %v1052_v39, 4  ;;  %v1020_v53 = vmax.f32 %v1018_v44, %v1019_v49 }
 0x264   : > { %v1039_v54 = vmul.f32 1.442695, %v1026_v50  ;;  %v1041_v42 = vmul.f32 1.442695, %v1027_v51 }
 0x265   : > { %v3002_v55 = vpop.eup %2206  ;;  %v1054_v58 = vadd.f32 %v1053_v52, %v1052_v39  ;;  %v1028_v59 = vsub.f32 %v963_v10, %v1020_v53 }
 0x266   : > { %v3004_v60 = vpop.eup %2208  ;;  %v1045_v61 = vsel %vm964_vm3, %v3002_v55, 0.0  ;;  %2214 = vpow2.f32 %v1039_v54 }
 0x267   : > { %v1055_v62 = vrot.slane %v1054_v58, 2  ;;  %v1046_v63 = vrot.slane %v1045_v61, 4  ;;  %v1066_v56 = vsel %vm964_vm3, %v3004_v60, 0.0  ;;  %2216 = vpow2.f32 %v1041_v42 }
 0x268   : > { %v1067_v57 = vrot.slane %v1066_v56, 4  ;;  %v1043_v0 = vmul.f32 1.442695, %v1028_v59 }
 0x269   : > { %v3010_v1 = vpop.eup %2210  ;;  %v1056_v2 = vadd.f32 %v1055_v62, %v1054_v58  ;;  %v1047_v3 = vadd.f32 %v1046_v63, %v1045_v61 }
 0x26a   : > { %v1068_v4 = vadd.f32 %v1067_v57, %v1066_v56  ;;  %v1059_v5 = vsel %vm964_vm3, %v3010_v1, 0.0  ;;  %2218 = vpow2.f32 %v1043_v0 }
 0x26b   : > { %v1048_v6 = vrot.slane %v1047_v3, 2  ;;  %v1060_v7 = vrot.slane %v1059_v5, 4  ;;  %v1057_v9 = vrot.slane %v1056_v2, 1 }
 0x26c   : > { %v3014_v10 = vpop.eup %2212  ;;  %v1069_v11 = vrot.slane %v1068_v4, 2 }
 0x26d   : > { %v1049_v12 = vadd.f32 %v1048_v6, %v1047_v3  ;;  %v1061_v20 = vadd.f32 %v1060_v7, %v1059_v5  ;;  %v1073_v21 = vsel %vm964_vm3, %v3014_v10, 0.0  ;;  %v1058_v22 = vadd.f32 %v1057_v9, %v1056_v2 }
 0x26e   : > { %v1070_v23 = vadd.f32 %v1069_v11, %v1068_v4  ;;  %v1074_v24 = vrot.slane %v1073_v21, 4 }
 0x26f   : > { %v1062_v25 = vrot.slane %v1061_v20, 2  ;;  %2220 = vrcp.f32 %v1058_v22  ;;  %v1050_v28 = vrot.slane %v1049_v12, 1  ;;  %v1256_v22 = vld [vmem:[%s3292_s10] sm:$0xff] }
 0x270   : > { %v3018_v29 = vpop.eup %2214  ;;  %v1075_v30 = vadd.f32 %v1074_v24, %v1073_v21  ;;  %v1071_v31 = vrot.slane %v1070_v23, 1  ;;  %v1258_v24 = vld [vmem:[%s3292_s10 + $0x10] sm:$0xff] }
 0x271   : > { %v2217_v32 = vpop.eup %2216  ;;  %v1063_v33 = vadd.f32 %v1062_v25, %v1061_v20  ;;  %v1080_v34 = vsel %vm964_vm3, %v3018_v29, 0.0  ;;  %v1051_v35 = vadd.f32 %v1050_v28, %v1049_v12  ;;  %v2521_v25 = vmov 0.0|0.0  }
 0x272   : > { %v1076_v36 = vrot.slane %v1075_v30, 2  ;;  %v1081_v26 = vrot.slane %v1080_v34, 4  ;;  %v1087_v27 = vsel %vm964_vm3, %v2217_v32, 0.0  ;;  %v1072_v37 = vadd.f32 %v1071_v31, %v1070_v23  ;;  %v1257_v23 = vld [vmem:[%s3292_s10 + $0x8] sm:$0xff]  ;;  %2016 = vmatprep.subr.bf16.mxu1 %v2521_v25  ;;  %v1260_v31 = vld [vmem:[%s3292_s10 + $0x20] sm:$0xff] }
 0x273   : > { %v1088_v38 = vrot.slane %v1087_v27, 4  ;;  %2222 = vrcp.f32 %v1051_v35  ;;  %v1064_v40 = vrot.slane %v1063_v33, 1  ;;  %v2017_v28 = vpack.c.bf16 %v1257_v23, %v1256_v22  ;;  %v1263_v35 = vld [vmem:[%s3292_s10 + $0x38] sm:$0xff] }
 0x274   : > { %v2219_v41 = vpop.eup %2218  ;;  %v1077_v43 = vadd.f32 %v1076_v36, %v1075_v30  ;;  %v1082_v44 = vadd.f32 %v1081_v26, %v1080_v34  ;;  %2224 = vrcp.f32 %v1072_v37  ;;  %v1262_v34 = vld [vmem:[%s3292_s10 + $0x30] sm:$0xff]  ;;  %v1264_v26 = vld [vmem:[%s3292_s10 + $0x40] sm:$0xff] }
 0x275   : > { %v1089_v45 = vadd.f32 %v1088_v38, %v1087_v27  ;;  %v1094_v46 = vsel %vm964_vm3, %v2219_v41, 0.0  ;;  %v1065_v47 = vadd.f32 %v1064_v40, %v1063_v33  ;;  %2018 = vmatpush3.bf16.msra.mxu1 %v2017_v28  ;;  %v2026_v36 = vpack.c.bf16 %v1263_v35, %v1262_v34  ;;  %v1265_v27 = vld [vmem:[%s3292_s10 + $0x48] sm:$0xff] }
 0x276   : > { %v1083_v49 = vrot.slane %v1082_v44, 2  ;;  %v1095_v39 = vrot.slane %v1094_v46, 4  ;;  %v1078_v50 = vrot.slane %v1077_v43, 1  ;;  %2019 = vmatprep.subr.bf16.mxu1 %v2521_v25  ;;  %v2029_v37 = vpack.c.bf16 %v1265_v27, %v1264_v26 }
 0x277   : > { %v1090_v51 = vrot.slane %v1089_v45, 2  ;;  %2226 = vrcp.f32 %v1065_v47  ;;  %v2523_v27 = vmov 0.0  }
 0x278   : > { %v1084_v52 = vadd.f32 %v1083_v49, %v1082_v44  ;;  %v1096_v53 = vadd.f32 %v1095_v39, %v1094_v46  ;;  %v1079_v54 = vadd.f32 %v1078_v50, %v1077_v43  ;;  %1955 = vmatprep.mubr.msk.f32.mxu1 %vm2522_vm13, %v2523_v27 }
 0x279   : > { %v2221_v42 = vpop.eup %2220  ;;  %v1091_v58 = vadd.f32 %v1090_v51, %v1089_v45 }
 0x27a   : > { %v1097_v59 = vrot.slane %v1096_v53, 2  ;;  %v1104_v61 = vmul.f32 %v2221_v42, %v2998_v48  ;;  %v1085_v62 = vrot.slane %v1084_v52, 1  ;;  %2228 = vrcp.f32 %v1079_v54 }
 0x27b   : > { %v1092_v63 = vrot.slane %v1091_v58, 1 }
 0x27c   : > { %v1098_v56 = vadd.f32 %v1097_v59, %v1096_v53  ;;  %1118 = vst.msk [vmem:[%s3291_s17 + $0x8] sm:$0xff] %vm964_vm3, %v1104_v61  ;;  %1132 = vperm.xlu1 %2187, %v1104_v61   ;;  %v1086_v57 = vadd.f32 %v1085_v62, %v1084_v52 }
 0x27d   : > { %v2223_v0 = vpop.eup %2222  ;;  %v1093_v2 = vadd.f32 %v1092_v63, %v1091_v58 }
 0x27e   : > { %v2225_v3 = vpop.eup %2224  ;;  %v1102_v4 = vmul.f32 %v2223_v0, %v3002_v55  ;;  %2230 = vrcp.f32 %v1086_v57  ;;  %v1099_v5 = vrot.slane %v1098_v56, 1 }
 0x27f   : > { %v1108_v48 = vmul.f32 %v2225_v3, %v3004_v60  ;;  %2232 = vrcp.f32 %v1093_v2 }
 0x280   : > { %1117 = vst.msk [vmem:[%s3291_s17] sm:$0xff] %vm964_vm3, %v1102_v4  ;;  %1127 = vperm.xlu0 %2186, %v1102_v4   ;;  %v1100_v6 = vadd.f32 %v1099_v5, %v1098_v56 }
 0x281   : > { %v2227_v7 = vpop.eup %2226  ;;  %1120 = vst.msk [vmem:[%s3291_s17 + $0x18] sm:$0xff] %vm964_vm3, %v1108_v48  ;;  %1142 = vperm.xlu1 %2187, %v1108_v48  }
 0x282   : > { %v1106_v55 = vmul.f32 %v2227_v7, %v3010_v1  ;;  %2234 = vrcp.f32 %v1100_v6 }
 0x284   : > { %v2229_v9 = vpop.eup %2228  ;;  %1119 = vst.msk [vmem:[%s3291_s17 + $0x10] sm:$0xff] %vm964_vm3, %v1106_v55 }
 0x285   : > { %1137 = vperm.xlu1 %2187, %v1106_v55   ;;  %v1110_v60 = vmul.f32 %v2229_v9, %v3014_v10 }
 0x287   : > { %1121 = vst.msk [vmem:[%s3291_s17 + $0x20] sm:$0xff] %vm964_vm3, %v1110_v60 }
 0x288   : > { %v2231_v11 = vpop.eup %2230 }
 0x289   : > { %v2233_v12 = vpop.eup %2232  ;;  %v1112_v20 = vmul.f32 %v2231_v11, %v3018_v29  ;;  %v1259_v29 = vld [vmem:[%s3292_s10 + $0x18] sm:$0xff] }
 0x28a   : > { %v1114_v1 = vmul.f32 %v2233_v12, %v2217_v32  ;;  %v2020_v30 = vpack.c.bf16 %v1259_v29, %v1258_v24  ;;  %v1261_v32 = vld [vmem:[%s3292_s10 + $0x28] sm:$0xff] }
 0x28b   : > { %1122 = vst.msk [vmem:[%s3291_s17 + $0x28] sm:$0xff] %vm964_vm3, %v1112_v20  ;;  %1152 = vperm.xlu1 %2187, %v1112_v20   ;;  %v2023_v33 = vpack.c.bf16 %v1261_v32, %v1260_v31 }
 0x28c   : > { %v2235_v21 = vpop.eup %2234  ;;  %1123 = vst.msk [vmem:[%s3291_s17 + $0x30] sm:$0xff] %vm964_vm3, %v1114_v1  ;;  %2021 = vmatpush3.bf16.msra.mxu1 %v2020_v30 }
 0x28d   : > { %v1116_v10 = vmul.f32 %v2235_v21, %v2219_v41  ;;  %2022 = vmatprep.subr.bf16.mxu1 %v2521_v25 }
 0x28f   : > { %1147 = vperm.xlu1 %2187, %v1110_v60   ;;  %1124 = vst.msk [vmem:[%s3291_s17 + $0x38] sm:$0xff] %vm964_vm3, %v1116_v10  ;;  %vm1249_vm3 = vcmask 1047559  }
 0x290   : > { %2024 = vmatpush3.bf16.msra.mxu1 %v2023_v33 }
 0x291   : > { %2025 = vmatprep.subr.bf16.mxu1 %v2521_v25 }
 0x293   : > { %1157 = vperm.xlu1 %2187, %v1114_v1  }
 0x294   : > { %2027 = vmatpush3.bf16.msra.mxu1 %v2026_v36 }
 0x295   : > { %2028 = vmatprep.subr.bf16.mxu1 %v2521_v25 }
 0x297   : > { %1162 = vperm.xlu1 %2187, %v1116_v10  }
 0x298   : > { %2030 = vmatpush3.bf16.msra.mxu1 %v2029_v37 }
 0x299   : > { %2031 = vmatprep.subr.bf16.mxu1 %v2521_v25 }
 0x2fb   : > { %v1133_v38 = vpop.permute.xlu1 %1132 }
 0x2fc   : > { %v1166_v40 = vmul.f32 %v1133_v38, %v2904_v13 }
 0x2fe   : > { %v1180_v43 = vsel %vm698_vm0, %v1166_v40, 0.0 }
 0x2ff   : > { %v1128_v41 = vpop.permute.xlu0 %1127  ;;  %v1181_v49 = vrot.slane %v1180_v43, 4 }
 0x300   : > { %v1143_v44 = vpop.permute.xlu1 %1142  ;;  %v1165_v45 = vmul.f32 %v1128_v41, %v2891_v8 }
 0x301   : > { %v1168_v46 = vmul.f32 %v1143_v44, %v2918_v15  ;;  %v1182_v53 = vadd.f32 %v1181_v49, %v1180_v43 }
 0x302   : > { %v1173_v47 = vsel %vm698_vm0, %v1165_v45, 0.0 }
 0x303   : > { %v1174_v39 = vrot.slane %v1173_v47, 4  ;;  %v1194_v51 = vsel %vm698_vm0, %v1168_v46, 0.0  ;;  %v1183_v8 = vrot.slane %v1182_v53, 2 }
 0x304   : > { %v1138_v50 = vpop.permute.xlu1 %1137  ;;  %v1195_v54 = vrot.slane %v1194_v51, 4 }
 0x305   : > { %v1167_v52 = vmul.f32 %v1138_v50, %v2909_v14  ;;  %v1175_v42 = vadd.f32 %v1174_v39, %v1173_v47  ;;  %v1184_v3 = vadd.f32 %v1183_v8, %v1182_v53 }
 0x306   : > { %v1196_v62 = vadd.f32 %v1195_v54, %v1194_v51 }
 0x307   : > { %v1187_v13 = vsel %vm698_vm0, %v1167_v52, 0.0  ;;  %v1176_v63 = vrot.slane %v1175_v42, 2  ;;  %v1185_v60 = vrot.slane %v1184_v3, 1 }
 0x308   : > { %v1188_v58 = vrot.slane %v1187_v13, 4  ;;  %v1197_v4 = vrot.slane %v1196_v62, 2 }
 0x309   : > { %v1177_v5 = vadd.f32 %v1176_v63, %v1175_v42  ;;  %v1186_v24 = vadd.f32 %v1185_v60, %v1184_v3  ;;  %v1350_v63 = vld [vmem:[#allocation9 + $0x18] sm:$0xff] }
 0x30a   : > { %v1189_v59 = vadd.f32 %v1188_v58, %v1187_v13  ;;  %v1153_v61 = vpop.permute.xlu1 %1152  ;;  %v1198_v11 = vadd.f32 %v1197_v4, %v1196_v62  ;;  %v1347_v58 = vld [vmem:[#allocation9] sm:$0xff]  ;;  %v1349_v62 = vld [vmem:[#allocation9 + $0x10] sm:$0xff] }
 0x30b   : > { %v1170_v15 = vmul.f32 %v1153_v61, %v2932_v17  ;;  %v1178_v12 = vrot.slane %v1177_v5, 1  ;;  %v689_v61 = vld [vmem:[#allocation6] sm:$0xff] }
 0x30c   : > { %v1190_v56 = vrot.slane %v1189_v59, 2  ;;  %v1199_v29 = vrot.slane %v1198_v11, 1 }
 0x30d   : > { %v1208_v57 = vsel %vm698_vm0, %v1170_v15, 0.0  ;;  %v1179_v30 = vadd.f32 %v1178_v12, %v1177_v5 }
 0x30e   : > { %v1209_v0 = vrot.slane %v1208_v57, 4  ;;  %v1148_v2 = vpop.permute.xlu1 %1147  ;;  %v1191_v48 = vadd.f32 %v1190_v56, %v1189_v59  ;;  %v1200_v43 = vadd.f32 %v1199_v29, %v1198_v11  ;;  %v1348_v59 = vld [vmem:[#allocation9 + $0x8] sm:$0xff] }
 0x30f   : > { %v1169_v14 = vmul.f32 %v1148_v2, %v2923_v16  ;;  %v1238_v37 = vsel %vm1237_vm11, %v1186_v24, %v1179_v30  ;;  %v2032_v8 = vpack.c.bf16 %v1348_v59, %v1347_v58 }
 0x310   : > { %v1210_v7 = vadd.f32 %v1209_v0, %v1208_v57  ;;  %v1192_v1 = vrot.slane %v1191_v48, 1  ;;  %v2035_v57 = vpack.c.bf16 %v1350_v63, %v1349_v62  ;;  %v688_v0 = vld [vmem:[#allocation3] sm:$0xff] }
 0x311   : > { %v1201_v6 = vsel %vm698_vm0, %v1169_v14, 0.0  ;;  %v1847_v14 = vld [vmem:[%s3293_s1] ss:$0 sm:$0xff] }
 0x312   : > { %v1202_v55 = vrot.slane %v1201_v6, 4  ;;  %v1158_v9 = vpop.permute.xlu1 %1157  ;;  %v1211_v10 = vrot.slane %v1210_v7, 2 }
 0x313   : > { %v1171_v17 = vmul.f32 %v1158_v9, %v2937_v18  ;;  %v1193_v18 = vadd.f32 %v1192_v1, %v1191_v48 }
 0x314   : > { %v1203_v20 = vadd.f32 %v1202_v55, %v1201_v6  ;;  %v1212_v34 = vadd.f32 %v1211_v10, %v1210_v7  ;;  %v1845_v6 = vld [vmem:[%s3294_s14] ss:$0 sm:$0xff] }
 0x315   : > { %v1215_v21 = vsel %vm698_vm0, %v1171_v17, 0.0 }
 0x316   : > { %v1204_v22 = vrot.slane %v1203_v20, 2  ;;  %v1216_v16 = vrot.slane %v1215_v21, 4  ;;  %v1163_v23 = vpop.permute.xlu1 %1162  ;;  %v1213_v44 = vrot.slane %v1212_v34, 1 }
 0x317   : > { %v1172_v28 = vmul.f32 %v1163_v23, %v2946_v19  ;;  %v1240_v19 = vsel %vm1239_vm12, %v1193_v18, %v1238_v37 }
 0x318   : > { %v1205_v31 = vadd.f32 %v1204_v22, %v1203_v20  ;;  %v1217_v32 = vadd.f32 %v1216_v16, %v1215_v21  ;;  %v1242_v49 = vsel %vm1241_vm14, %v1200_v43, %v1240_v19  ;;  %v1214_v51 = vadd.f32 %v1213_v44, %v1212_v34 }
 0x319   : > { %v1222_v33 = vsel %vm698_vm0, %v1172_v28, 0.0  ;;  %vm1245_vm0 = vcmask 1045509  }
 0x31a   : > { %v1206_v35 = vrot.slane %v1205_v31, 1  ;;  %v1218_v36 = vrot.slane %v1217_v32, 2  ;;  %v1223_v26 = vrot.slane %v1222_v33, 4 }
 0x31c   : > { %v1219_v38 = vadd.f32 %v1218_v36, %v1217_v32  ;;  %v1224_v40 = vadd.f32 %v1223_v26, %v1222_v33  ;;  %v1207_v41 = vadd.f32 %v1206_v35, %v1205_v31 }
 0x31e   : > { %v1220_v45 = vrot.slane %v1219_v38, 1  ;;  %v1225_v46 = vrot.slane %v1224_v40, 2  ;;  %v1244_v50 = vsel %vm1243_vm15, %v1207_v41, %v1242_v49 }
 0x31f   : > { %v1246_v13 = vsel %vm1245_vm0, %v1214_v51, %v1244_v50 }
 0x320   : > { %v1226_v47 = vadd.f32 %v1225_v46, %v1224_v40  ;;  %v1221_v39 = vadd.f32 %v1220_v45, %v1219_v38 }
 0x322   : > { %v1227_v52 = vrot.slane %v1226_v47, 1  ;;  %v1248_v54 = vsel %vm1247_vm2, %v1221_v39, %v1246_v13 }
 0x324   : > { %v1228_v53 = vadd.f32 %v1227_v52, %v1226_v47 }
 0x326   : > { %v1250_v42 = vsel %vm1249_vm3, %v1228_v53, %v1248_v54 }
 0x327   : > { %1251 = vrot.lane.b32.xlu1 %v1250_v42, %s2524_s15  ;;  %s2527_s15 = smov 96  }
 0x399   : > { %v1252_v15 = vpop.permute.xlu1 %1251 }
 0x39a   : > { %v1255_v56 = vsel %vm1254_vm4, %v689_v61, %v1252_v15 }
 0x39b   : > { %1956 = vmatmul.mubr.msk.f32.vlgmr.msra.gmra.mrb[0].mxu1 %vm1273_vm5, %v1255_v56 }
 0x39c   : > { %2033 = vmatpush3.bf16.msra.mxu1 %v2032_v8  ;;  %1966 = vmatprep.mubr.msk.f32.mxu1 %vm2522_vm13, %v2523_v27 }
 0x39d   : > { %2034 = vmatprep.subr.bf16.mxu1 %v2521_v25 }
 0x3a0   : > { %2036 = vmatpush3.bf16.msra.mxu1 %v2035_v57 }
 0x3a3   : > { %1967 = vmatmul.mubr.msk.f32.vlgmr.msra.gmra.mrb[2].mxu1 %vm915_vm1, %v688_v0 }
 0x46e   : > { %v1343_v2 = vpop.f32.mrb[0].mxu1 }
 0x46f   : > { %v1957_v3 = vpop.f32.mrb[1].mxu1  ;;  %v1344_v25 = vadd.f32 %v1845_v6, %v1343_v2 }
 0x476   : > { %v1427_v4 = vpop.f32.mrb[2].mxu1 }
 0x477   : > { %v1428_v5 = vadd.f32 %v1847_v14, %v1427_v4  ;;  %v1968_v48 = vpop.f32.mrb[3].mxu1 }
 0x479   : > { %1439 = vrot.lane.b32.xlu0 %v1428_v5, %s2525_s16  ;;  %v1431_v7 = vadd.f32 %v1428_v5, %v1344_v25 }
 0x47b   : > { %v1849_v55 = vmul.f32 -1.442695, %v1431_v7 }
 0x47d   : > { %2236 = vpow2.f32 %v1849_v55 }
 0x487   : > { %v2237_v9 = vpop.eup %2236 }
 0x488   : > { %v1435_v60 = vadd.f32 1.0, %v2237_v9 }
 0x48a   : > { %2238 = vrcp.f32 %v1435_v60 }
 0x494   : > { %v2239_v17 = vpop.eup %2238 }
 0x495   : > { %v1449_v22 = vsub.f32 1.0, %v2239_v17 }
 0x4eb   : > { %v1440_v11 = vpop.permute.xlu0 %1439 }
 0x4ec   : > { %v1442_v12 = vmul.f32 %v2239_v17, %v1440_v11 }
 0x4ee   : > { %1444 = vrot.lane.b32.xlu1 %v1442_v12, %s2525_s16 }
 0x4f2   : > { %1455 = vrot.lane.b32.xlu1 %v688_v0, %s2526_s6 }
 0x4f6   : > { %1465 = vrot.lane.b32.xlu1 %v1250_v42, %s2526_s6 }
 0x560   : > { %v1445_v20 = vpop.permute.xlu1 %1444 }
 0x561   : > { %v1447_v1 = vadd.f32 %v1445_v20, %v1344_v25 }
 0x563   : > { %2240 = vtanh.f32 %v1447_v1 }
 0x564   : > { %v1456_v10 = vpop.permute.xlu1 %1455 }
 0x565   : > { %v1458_v23 = vmul.f32 %v2239_v17, %v1456_v10 }
 0x568   : > { %v1466_v30 = vpop.permute.xlu1 %1465 }
 0x56d   : > { %v2241_v21 = vpop.eup %2240 }
 0x56e   : > { %1451 = vrot.lane.b32.xlu0 %v2241_v21, %s2527_s15 }
 0x5e0   : > { %v1452_v16 = vpop.permute.xlu0 %1451 }
 0x5e1   : > { %v1454_v24 = vmul.f32 %v1452_v16, %v1449_v22 }
 0x5e3   : > { %v1459_v28 = vadd.f32 %v1458_v23, %v1454_v24 }
 0x5e5   : > { %1461 = vrot.lane.b32.xlu0 %v1459_v28, %s2527_s15 }
 0x5e9   : > { %1469 = vrot.lane.b32.xlu0 %v689_v61, %s2527_s15 }
 0x657   : > { %v1462_v29 = vpop.permute.xlu0 %1461 }
 0x658   : > { %1464 = vst.msk [vmem:[#allocation13] sm:$0xff] %vm915_vm1, %v1462_v29  ;;  %v1472_v31 = vsel %vm915_vm1, %v1462_v29, %v1466_v30 }
 0x65b   : > { %v1470_v32 = vpop.permute.xlu0 %1469 }
 0x65c   : > { %v1474_v18 = vsel %vm1473_vm6, %v1472_v31, %v1470_v32 }
 0x65d   : > { %1476 = vst.msk [vmem:[#allocation2] sm:$0xff] %vm1475_vm7, %v1474_v18 }
 0x65e PF: > { %v1478_v33 = vld [vmem:[%s2852_s13] sm:$0xff]  ;;  %v1479_v34 = vld [vmem:[%s2852_s13 + $0x8] sm:$0xff]  ;;  %v1480_v35 = vld [vmem:[%s2852_s13 + $0x10] sm:$0xff]  ;;  %v2528_v36 = vmov 0.0|0.0   ;;  %vm2529_vm1 = vmmov 0   ;;  %v2530_v37 = vmov 0.0  }
 0x65f   : > { %2037 = vmatprep.subr.bf16.mxu0 %v2528_v36  ;;  %v2038_v26 = vpack.c.bf16 %v1479_v34, %v1478_v33  ;;  %v1481_v27 = vld [vmem:[%s2852_s13 + $0x18] sm:$0xff]  ;;  %1997 = vmatprep.mubr.msk.f32.mxu0 %vm2529_vm1, %v2530_v37  ;;  %v1482_v40 = vld [vmem:[%s2852_s13 + $0x20] sm:$0xff]  ;;  %v1483_v19 = vld [vmem:[%s2852_s13 + $0x28] sm:$0xff]  ;;  %vm1499_vm8 = vcmask 916480   ;;  %s2531_s2 = smov [#allocation13]   ;;  %p3295_p10 = scmp.eq.s32.totalorder %s2644_s24, 1 }
 0x660   : > { %v2041_v38 = vpack.c.bf16 %v1481_v27, %v1480_v35  ;;  %v2044_v41 = vpack.c.bf16 %v1483_v19, %v1482_v40  ;;  %v1484_v43 = vld [vmem:[%s2852_s13 + $0x30] sm:$0xff]  ;;  %v1485_v44 = vld [vmem:[%s2852_s13 + $0x38] sm:$0xff]  ;;  %v1486_v46 = vld [vmem:[%s2852_s13 + $0x40] sm:$0xff]  ;;  %s1608_s29 = sshll.u32 %s2531_s2, 4  ;;  %s1609_s29 = int_to_ptr.vmem [resolvable:$true] %s1608_s29 }
 0x661   : > { %2039 = vmatpush3.bf16.msra.mxu0 %v2038_v26  ;;  %v2047_v45 = vpack.c.bf16 %v1485_v44, %v1484_v43  ;;  %v1487_v47 = vld [vmem:[%s2852_s13 + $0x48] sm:$0xff]  ;;  %v1488_v39 = vld [vmem:[%s2852_s13 + $0x50] sm:$0xff]  ;;  %v1489_v50 = vld [vmem:[%s2852_s13 + $0x58] sm:$0xff]  ;;  %s2384_s1 = scalar_lea.vmem %s1609_s29, 128  ;;  %p2391_p8 = scmp.lt.s32.totalorder %s1609_s29, %s1609_s29 }
 0x662   : > { %2040 = vmatprep.subr.bf16.mxu0 %v2528_v36  ;;  %v2050_v49 = vpack.c.bf16 %v1487_v47, %v1486_v46  ;;  %v2053_v51 = vpack.c.bf16 %v1489_v50, %v1488_v39  ;;  %v1490_v52 = vld [vmem:[%s2852_s13 + $0x60] sm:$0xff]  ;;  %v1491_v53 = vld [vmem:[%s2852_s13 + $0x68] sm:$0xff]  ;;  %p2385_p3 = scmp.ne.s32.totalorder %s1609_s29, %s2384_s1  ;;  %p2392_p12 = scmp.lt.s32.totalorder %s2384_s1, %s2384_s1 }
 0x663   : > { %v2056_v13 = vpack.c.bf16 %v1491_v53, %v1490_v52 }
 0x664   : > { %v1477_v54 = vld [vmem:[#allocation2] sm:$0xff]  ;;  %p2386_p13 = pnand %p2385_p3, %p3295_p10  ;;  %p2393_p7 = por %p2392_p12, %p2391_p8 }
 0x665   : > { %2042 = vmatpush3.bf16.msra.mxu0 %v2041_v38 }
 0x666   : > { %2043 = vmatprep.subr.bf16.mxu0 %v2528_v36  ;;  %p2387_p2 = pneg %p2386_p13 }
 0x668   : > { %p2394_p4 = pnand %p2393_p7, %p2387_p2 }
 0x669   : > { %2045 = vmatpush3.bf16.msra.mxu0 %v2044_v41 }
 0x66a   : > { %2046 = vmatprep.subr.bf16.mxu0 %v2528_v36 }
 0x66d   : > { %2048 = vmatpush3.bf16.msra.mxu0 %v2047_v45 }
 0x66e   : > { %2049 = vmatprep.subr.bf16.mxu0 %v2528_v36 }
 0x671   : > { %2051 = vmatpush3.bf16.msra.mxu0 %v2050_v49 }
 0x672   : > { %2052 = vmatprep.subr.bf16.mxu0 %v2528_v36 }
 0x675   : > { %2054 = vmatpush3.bf16.msra.mxu0 %v2053_v51 }
 0x676   : > { %2055 = vmatprep.subr.bf16.mxu0 %v2528_v36 }
 0x679   : > { %2057 = vmatpush3.bf16.msra.mxu0 %v2056_v13 }
 0x67c   : > { %1998 = vmatmul.mubr.msk.f32.vlgmr.msra.gmra.mrb[0].mxu0 %vm1499_vm8, %v1477_v54 }
 0x67d   : > { %2397 = shalt.err (!%p2394_p4)
}
 0x67e   : > { %s3296_s18 = sld [smem:[#allocation33_spill]]  ;;  %p3298_p0 = pmov %p3295_p10 }
 0x684   : > { %s3297_s25 = smov %s3296_s18  ;;  %s2398_s14 = scalar_lea.hbm %s3296_s18, 128 }
 0x685   : > { %p2399_p11 = scmp.ne.s32.totalorder %s3297_s25, %s2398_s14  ;;  %p2404_p9 = scmp.lt.u32.totalorder %s2398_s14, %s3297_s25 }
 0x687   : > { %p2400_p6 = pnand %p2399_p11, %p3298_p0 }
 0x689   : > { %p2401_p1 = pneg %p2400_p6 }
 0x68b   : > { %p2406_p5 = pnand %p2404_p9, %p2401_p1 }
 0x68d   : > { %2409 = shalt.err (!%p2406_p5)
}
 0x68e   : > { %p3299_p3 = pmov %p3298_p0  ;;  %s3300_s13 = sld [smem:[#allocation22_spill]] }
 0x68f   : > { %s3301_s6 = scalar_lea.vmem %s3236_s12, %s2861_s26  ;;  %s1853_s28 = sshll.u32 %s2500_s21, 7 }
 0x690   : > { %2080 = dma.vmem_to_hbm [thread:$0]  (%p3299_p3), %s1609_s29, 128, %s3297_s25, [#allocation14]   ;;  %v1850_v42 = vld [vmem:[%s3301_s6] ss:$0 sm:$0xff] }
 0x691   : > { %s1595_s14 = sshll.u32 %s2867_s9, 4  ;;  %s3302_s0 = sld [smem:[#allocation32_spill]]  ;;  %s3172_s14 = int_to_ptr.vmem [resolvable:$true] %s1595_s14 }
 0x692   : > { %s1575_s29 = scalar_lea.sflag [#allocation5], %s2849_s30  ;;  %s2410_s16 = scalar_lea.vmem %s3172_s14, 128 }
 0x693   : > { %p2411_p10 = scmp.ne.s32.totalorder %s3172_s14, %s2410_s16  ;;  %s2532_s21 = smov [#allocation12]  }
 0x694   : > { %p3303_p13 = scmp.ne.s32.totalorder %s3300_s13, 0  ;;  %s2414_s26 = sshll.u32 %s2532_s21, 4  ;;  %s2415_s26 = int_to_ptr.vmem [resolvable:$false] %s2414_s26 }
 0x695   : > { %s2416_s18 = scalar_lea.vmem %s2415_s26, 256  ;;  %p2417_p12 = scmp.lt.s32.totalorder %s3172_s14, %s2415_s26 }
 0x696   : > { %p2412_p2 = pnand %p2411_p10, %p3303_p13  ;;  %p2418_p7 = scmp.lt.s32.totalorder %s2416_s18, %s2410_s16 }
 0x697   : > { %s3170_s1 = scalar_lea.hbm %s3302_s0, %s1853_s28 }
 0x698   : > { %p2413_p8 = pneg %p2412_p2  ;;  %p2419_p4 = por %p2418_p7, %p2417_p12 }
 0x69a   : > { %p2420_p11 = pnand %p2419_p4, %p2413_p8 }
 0x74f   : > { %v1569_v58 = vpop.f32.mrb[0].mxu0 }
 0x750   : > { %v1570_v59 = vadd.f32 %v1850_v42, %v1569_v58  ;;  %v1999_v61 = vpop.f32.mrb[1].mxu0 }
 0x752   : > { %1573 = vst [vmem:[%s2867_s9] sm:$0xff] %v1570_v59 }
 0x753   : > { %2423 = shalt.err (!%p2420_p11)
}
 0x754   : > { %s2424_s30 = scalar_lea.hbm %s3170_s1, 128  ;;  %s2428_s28 = scalar_lea.hbm %s3302_s0, 256 }
 0x755   : > { %p2425_p0 = scmp.ne.s32.totalorder %s3170_s1, %s2424_s30  ;;  %p2429_p9 = scmp.lt.u32.totalorder %s3170_s1, %s3302_s0 }
 0x756   : > { %p2430_p5 = scmp.lt.u32.totalorder %s2428_s28, %s2424_s30  ;;  %p2432_p10 = scmp.lt.u32.totalorder %s2424_s30, %s3170_s1 }
 0x757   : > { %p2426_p6 = pnand %p2425_p0, %p3303_p13 }
 0x758   : > { %p2431_p3 = por %p2430_p5, %p2429_p9 }
 0x759   : > { %p2427_p1 = pneg %p2426_p6 }
 0x75a   : > { %p2433_p2 = por %p2432_p10, %p2431_p3 }
 0x75c   : > { %p2434_p8 = pnand %p2433_p2, %p2427_p1 }
 0x75e   : > { %2437 = shalt.err (!%p2434_p8)
}
 0x75f   : > { %2078 = dma.vmem_to_hbm [thread:$0]  (%p3303_p13), %s3172_s14, 128, %s3170_s1, %s1575_s29  }
 0x760   : > { %p3304_p12 = scmp.eq.s32.totalorder %s2644_s24, 1 }
 0x762   : > { %2479 = dma.done.wait (%p3304_p12), [#allocation14], 128   ;;  %p3305_p7 = pmov %p3304_p12 }
 0x764   : > { %2481 = vsyncadd (%p3305_p7), [#allocation14], 4294967168 }
 0x765 PF: > { %s3306_s16 = sld [smem:[#allocation21_spill]]  ;;  %s3307_s21 = sld [smem:[#allocation23_spill]] }
 0x766   : > { %p3309_p11 = scmp.ge.s32.totalorder %s2508_s23, 2 }
 0x76b   : > { %s1636_s26 = sand.u32 1, %s3306_s16   ;;  %p3308_p4 = scmp.ne.s32.totalorder %s3307_s21, 0 }
 0x76c   : > { %s1637_s18 = scalar_lea.sflag [#allocation5], %s1636_s26 }
 0x76d   : > { %p2102_p0 = pnand %p3309_p11, %p3308_p4 }
 0x76f   : > { %2483 = dma.done.wait (!%p2102_p0), %s1637_s18, 128  }
 0x770   : > { %2485 = vsyncadd (!%p2102_p0), %s1637_s18, 4294967168  ;;  %s33_s23 = sadd.s32 1, %s2508_s23   ;;  %s3310_s18 = smov %s2492_s19 }
 0x771   : > { %p30_p6 = scmp.ge.s32.totalorder %s33_s23, 4   ;;  %s3311_s19 = smov %s2496_s20 }
 0x772   : > { %s3312_s20 = smov %s2799_s3  ;;  %s3313_s21 = smov %s2504_s22 }
 0x773   : > { %s3314_s22 = smov %s3316_s7  ;;  %32 = sbr.rel (!%p30_p6) target bundleno = 20 (0x14), region = 169 }
 0x77a   :  { %1642 = vsyncpa [#allocation4], 1 }
 0x77b   :  { %1644 = vsyncpa [#allocation4 + $0x1], 1 }
 0x77c   :  { %1645 = vsyncpa [#allocation7], 1 }
 0x77d   :  { %1646 = vsyncpa [#allocation10], 1 }
 0x77e   :  { %1647 = vsyncpa [#allocation5], 1 }
 0x77f   :  { %1649 = vsyncpa [#allocation5 + $0x1], 1 }
 0x780   :  { %1650 = vsyncpa [#allocation14], 1 }

</bundles_post_ra>
